<compile_context>
chip_gen: v7x
topology: tpu7x:2x2x1
jax: 0.10.0
libtpu: 0.0.40
codegen_flags: <defaults>
</compile_context>

<pallas_src>
import functools
import math

import jax
import jax.numpy as jnp
from jax.experimental import pallas as pl
from jax.experimental.pallas import tpu as pltpu


# ---------------------------------------------------------------------------
# Fused encoder kernel: one grid step == one encoder layer.
# Residual stream lives in o_ref (resident output block) across the layer axis.
# ---------------------------------------------------------------------------
def _encoder_kernel(x_ref, maskb_ref,
                    ln1_ref, wqkv_ref, bqkv_ref, wo_ref, bo_ref,
                    ln2_ref, w1_ref, b1_ref, w2_ref, b2_ref, lnf_ref,
                    o_ref, *, B, S, H, eps):
    layer = pl.program_id(0)
    n_layers = pl.num_programs(0)

    # Initialize the resident residual stream from the input on the first step.
    @pl.when(layer == 0)
    def _():
        o_ref[...] = x_ref[...]

    x = o_ref[...].astype(jnp.float32)            # (R, D), R = B*S
    R, D = x.shape
    dk = D // H

    def layer_norm(v, ab):
        # Matches the reference module: unbiased std (divide by D-1), eps on std.
        mean = jnp.mean(v, axis=-1, keepdims=True)
        vc = v - mean
        var = jnp.sum(vc * vc, axis=-1, keepdims=True) * (1.0 / (D - 1))
        std = jnp.sqrt(var)
        return ab[0:1, :] * vc / (std + eps) + ab[1:2, :]

    # ---- sublayer 1: x + Wo(self_attn(LN1(x))) ------------------------------
    xn = layer_norm(x, ln1_ref[...])
    # fused QKV projection: one (R,D)@(D,3D) MXU pass; 1/sqrt(dk) folded into Wq.
    qkv = jnp.dot(xn, wqkv_ref[...], preferred_element_type=jnp.float32) + bqkv_ref[...]
    mask_bias = maskb_ref[...]                    # (B, 1, S) additive: 0 keep / -1e9 masked

    ctx_parts = []
    for h in range(H):                            # static unroll over heads (H small)
        q_h = qkv[:, 0 * D + h * dk: 0 * D + (h + 1) * dk].reshape(B, S, dk)
        k_h = qkv[:, 1 * D + h * dk: 1 * D + (h + 1) * dk].reshape(B, S, dk)
        v_h = qkv[:, 2 * D + h * dk: 2 * D + (h + 1) * dk].reshape(B, S, dk)
        s_h = jnp.einsum('bqd,bkd->bqk', q_h, k_h,
                         preferred_element_type=jnp.float32)       # (B, S, S)
        s_h = s_h + mask_bias                                      # broadcast over q dim
        m_h = jnp.max(s_h, axis=-1, keepdims=True)
        e_h = jnp.exp(s_h - m_h)
        p_h = e_h * pl.reciprocal(jnp.sum(e_h, axis=-1, keepdims=True), approx=True)
        c_h = jnp.einsum('bqk,bkd->bqd', p_h, v_h,
                         preferred_element_type=jnp.float32)       # (B, S, dk)
        ctx_parts.append(c_h.reshape(R, dk))
    ctx = jnp.concatenate(ctx_parts, axis=-1)     # merged heads, lane-dense (R, D)

    attn_out = jnp.dot(ctx, wo_ref[...], preferred_element_type=jnp.float32) + bo_ref[...]
    x = x + attn_out                              # fused residual add

    # ---- sublayer 2: x + W2(relu(W1(LN2(x)))) -------------------------------
    xn = layer_norm(x, ln2_ref[...])
    hidden = jnp.dot(xn, w1_ref[...], preferred_element_type=jnp.float32) + b1_ref[...]
    hidden = jnp.maximum(hidden, 0.0)
    ff = jnp.dot(hidden, w2_ref[...], preferred_element_type=jnp.float32) + b2_ref[...]
    x = x + ff                                    # fused residual add

    # Write back the residual stream; on the last layer apply the final LayerNorm.
    @pl.when(layer < n_layers - 1)
    def _():
        o_ref[...] = x.astype(o_ref.dtype)

    @pl.when(layer == n_layers - 1)
    def _():
        o_ref[...] = layer_norm(x, lnf_ref[...]).astype(o_ref.dtype)


# ---------------------------------------------------------------------------
# Parameter construction (deterministic, synthetic), pre-packed for the kernel:
#   - per-layer weights stacked along a leading layer axis,
#   - Wq/Wk/Wv fused into one (D, 3D) matrix with 1/sqrt(dk) folded into Wq,
#   - LayerNorm (a, b) pairs packed as (layers, 2, D).
# ---------------------------------------------------------------------------
def init_params(key, n_layers, d_model, n_heads, d_ff):
    dk = d_model // n_heads
    scale = 1.0 / math.sqrt(dk)

    wqkv, bqkv, wo, bo, w1, b1, w2, b2, ln1, ln2 = ([] for _ in range(10))
    for _ in range(n_layers):
        keys = jax.random.split(key, 7)
        key = keys[0]
        wq = 0.02 * jax.random.normal(keys[1], (d_model, d_model), jnp.float32)
        wk = 0.02 * jax.random.normal(keys[2], (d_model, d_model), jnp.float32)
        wv = 0.02 * jax.random.normal(keys[3], (d_model, d_model), jnp.float32)
        # fold attention scale into the Q projection (Q bias is zero, so no-op there)
        wqkv.append(jnp.concatenate([wq * scale, wk, wv], axis=1))
        bqkv.append(jnp.zeros((1, 3 * d_model), jnp.float32))
        wo.append(0.02 * jax.random.normal(keys[4], (d_model, d_model), jnp.float32))
        bo.append(jnp.zeros((1, d_model), jnp.float32))
        w1.append(0.02 * jax.random.normal(keys[5], (d_model, d_ff), jnp.float32))
        b1.append(jnp.zeros((1, d_ff), jnp.float32))
        w2.append(0.02 * jax.random.normal(keys[6], (d_ff, d_model), jnp.float32))
        b2.append(jnp.zeros((1, d_model), jnp.float32))
        ln1.append(jnp.stack([jnp.ones(d_model), jnp.zeros(d_model)]).astype(jnp.float32))
        ln2.append(jnp.stack([jnp.ones(d_model), jnp.zeros(d_model)]).astype(jnp.float32))

    return {
        'n_heads': n_heads,
        'wqkv': jnp.stack(wqkv), 'bqkv': jnp.stack(bqkv),
        'wo': jnp.stack(wo), 'bo': jnp.stack(bo),
        'w1': jnp.stack(w1), 'b1': jnp.stack(b1),
        'w2': jnp.stack(w2), 'b2': jnp.stack(b2),
        'ln1': jnp.stack(ln1), 'ln2': jnp.stack(ln2),
        'lnf': jnp.stack([jnp.ones(d_model), jnp.zeros(d_model)])[None].astype(jnp.float32),
    }


# ---------------------------------------------------------------------------
# Encoder forward: single fused pallas_call, grid over layers.
# ---------------------------------------------------------------------------
def encoder_forward(params, x, mask):
    # x: (B, S, D); mask: (B, 1, S) float (1.0 = attend, 0.0 = masked)
    B, S, D = x.shape
    H = params['n_heads']
    R = B * S
    n_layers = params['wqkv'].shape[0]
    d_ff = params['w1'].shape[-1]

    # additive attention bias: 0 where visible, -1e9 where masked (computed once)
    mask_bias = ((mask - 1.0) * 1e9).astype(jnp.float32)          # (B, 1, S)

    kernel = functools.partial(_encoder_kernel, B=B, S=S, H=H, eps=1e-6)

    # Leading per-layer axis squeezed out (None) -> kernel refs are 2-D, no [0] slicing.
    def lyr(shape):
        return pl.BlockSpec((None,) + shape, lambda l: (l, 0, 0))

    out2d = pl.pallas_call(
        kernel,
        grid=(n_layers,),
        in_specs=[
            pl.BlockSpec((R, D), lambda l: (0, 0)),               # x (read at layer 0 only)
            pl.BlockSpec((B, 1, S), lambda l: (0, 0, 0)),         # additive mask bias (const block)
            lyr((2, D)),                                          # ln1 (a, b)
            lyr((D, 3 * D)),                                      # fused Wqkv
            lyr((1, 3 * D)),                                      # fused bqkv
            lyr((D, D)),                                          # Wo
            lyr((1, D)),                                          # bo
            lyr((2, D)),                                          # ln2 (a, b)
            lyr((D, d_ff)),                                       # W1
            lyr((1, d_ff)),                                       # b1
            lyr((d_ff, D)),                                       # W2
            lyr((1, D)),                                          # b2
            pl.BlockSpec((None, 2, D), lambda l: (0, 0, 0)),      # final LayerNorm (a, b)
        ],
        out_specs=pl.BlockSpec((R, D), lambda l: (0, 0)),         # resident residual stream
        out_shape=jax.ShapeDtypeStruct((R, D), x.dtype),
        compiler_params=pltpu.CompilerParams(
            dimension_semantics=("arbitrary",)),                   # layer axis is sequential
    )(x.reshape(R, D), mask_bias,
      params['ln1'], params['wqkv'], params['bqkv'], params['wo'], params['bo'],
      params['ln2'], params['w1'], params['b1'], params['w2'], params['b2'],
      params['lnf'])

    return out2d.reshape(B, S, D)


if __name__ == "__main__":
    B, S, D, H, D_FF, N_LAYERS = 2, 8, 32, 4, 64, 2

    key = jax.random.PRNGKey(0)
    k_x, k_p = jax.random.split(key)
    x = jax.random.normal(k_x, (B, S, D), jnp.float32)

    # mask: first sequence fully visible, second sequence only first 5 positions
    lengths = jnp.array([8, 5])
    mask = (jnp.arange(S)[None, :] < lengths[:, None]).astype(jnp.float32)  # (B, S)
    mask = mask[:, None, :]                                                 # (B, 1, S)

    params = init_params(k_p, N_LAYERS, D, H, D_FF)

    # TODO(synk): dropout inside SublayerConnection is eval-mode identity here.
    out = encoder_forward(params, x, mask)
    jax.block_until_ready(out)
    assert out.shape == (B, S, D)
    print("KERNEL_OK")
</pallas_src>

<mosaic_0001>
module attributes {stable_mosaic.version = 11 : i64} {
  func.func @_encoder_kernel(%arg0: i32, %arg1: memref<16x32xf32, #tpu.memory_space<vmem>>, %arg2: memref<2x1x8xf32, #tpu.memory_space<vmem>>, %arg3: memref<1x2x32xf32, #tpu.memory_space<vmem>>, %arg4: memref<1x32x96xf32, #tpu.memory_space<vmem>>, %arg5: memref<1x1x96xf32, #tpu.memory_space<vmem>>, %arg6: memref<1x32x32xf32, #tpu.memory_space<vmem>>, %arg7: memref<1x1x32xf32, #tpu.memory_space<vmem>>, %arg8: memref<1x2x32xf32, #tpu.memory_space<vmem>>, %arg9: memref<1x32x64xf32, #tpu.memory_space<vmem>>, %arg10: memref<1x1x64xf32, #tpu.memory_space<vmem>>, %arg11: memref<1x64x32xf32, #tpu.memory_space<vmem>>, %arg12: memref<1x1x32xf32, #tpu.memory_space<vmem>>, %arg13: memref<1x2x32xf32, #tpu.memory_space<vmem>>, %arg14: memref<16x32xf32, #tpu.memory_space<vmem>>) attributes {dimension_semantics = [#tpu.dimension_semantics<arbitrary>], iteration_bounds = array<i64: 2>, scalar_prefetch = 0 : i64, scratch_operands = 0 : i64, tpu.core_type = #tpu.core_type<tc>, window_params = [{pipeline_mode = #tpu.pipeline_mode<synchronous>, transform_indices = @transform_0, window_bounds = array<i64: 16, 32>}, {pipeline_mode = #tpu.pipeline_mode<synchronous>, transform_indices = @transform_1, window_bounds = array<i64: 2, 1, 8>}, {transform_indices = @transform_2, window_bounds = array<i64: 1, 2, 32>}, {transform_indices = @transform_3, window_bounds = array<i64: 1, 32, 96>}, {transform_indices = @transform_4, window_bounds = array<i64: 1, 1, 96>}, {transform_indices = @transform_5, window_bounds = array<i64: 1, 32, 32>}, {transform_indices = @transform_6, window_bounds = array<i64: 1, 1, 32>}, {transform_indices = @transform_7, window_bounds = array<i64: 1, 2, 32>}, {transform_indices = @transform_8, window_bounds = array<i64: 1, 32, 64>}, {transform_indices = @transform_9, window_bounds = array<i64: 1, 1, 64>}, {transform_indices = @transform_10, window_bounds = array<i64: 1, 64, 32>}, {transform_indices = @transform_11, window_bounds = array<i64: 1, 1, 32>}, {pipeline_mode = #tpu.pipeline_mode<synchronous>, transform_indices = @transform_12, window_bounds = array<i64: 1, 2, 32>}, {pipeline_mode = #tpu.pipeline_mode<synchronous>, transform_indices = @transform_13, window_bounds = array<i64: 16, 32>}]} {
    %c0_i32 = arith.constant 0 : i32
    %0 = arith.cmpi eq, %arg0, %c0_i32 : i32
    %1 = arith.extui %0 : i1 to i32
    %c0_i32_0 = arith.constant 0 : i32
    %2 = arith.cmpi ne, %1, %c0_i32_0 : i32
    scf.if %2 {
      %c0_68 = arith.constant 0 : index
      %c0_69 = arith.constant 0 : index
      %176 = vector.load %arg1[%c0_68, %c0_69] : memref<16x32xf32, #tpu.memory_space<vmem>>, vector<16x32xf32>
      %c0_70 = arith.constant 0 : index
      %c0_71 = arith.constant 0 : index
      %177 = vector.load %arg14[%c0_70, %c0_71] : memref<16x32xf32, #tpu.memory_space<vmem>>, vector<16x32xf32>
      tpu.vector_store %arg14[%c0_70, %c0_71], %176 {strides = array<i32>} : memref<16x32xf32, #tpu.memory_space<vmem>>, vector<16x32xf32>,
    } else {
    }
    %c0 = arith.constant 0 : index
    %c0_1 = arith.constant 0 : index
    %3 = vector.load %arg14[%c0, %c0_1] : memref<16x32xf32, #tpu.memory_space<vmem>>, vector<16x32xf32>
    %c0_2 = arith.constant 0 : index
    %c0_3 = arith.constant 0 : index
    %c0_4 = arith.constant 0 : index
    %4 = vector.load %arg3[%c0_2, %c0_3, %c0_4] : memref<1x2x32xf32, #tpu.memory_space<vmem>>, vector<1x2x32xf32>
    %5 = vector.shape_cast %4 : vector<1x2x32xf32> to vector<2x32xf32>
    %cst = arith.constant dense<0.000000e+00> : vector<16xf32>
    %6 = vector.multi_reduction <add>, %3, %cst [1] : vector<16x32xf32> to vector<16xf32>
    %7 = vector.shape_cast %6 : vector<16xf32> to vector<16x1xf32>
    %cst_5 = arith.constant 3.200000e+01 : f32
    %8 = vector.broadcast %cst_5 : f32 to vector<16x1xf32>
    %9 = arith.divf %7, %8 : vector<16x1xf32>
    %10 = vector.broadcast %9 : vector<16x1xf32> to vector<16x32xf32>
    %11 = arith.subf %3, %10 : vector<16x32xf32>
    %12 = arith.mulf %11, %11 : vector<16x32xf32>
    %cst_6 = arith.constant dense<0.000000e+00> : vector<16xf32>
    %13 = vector.multi_reduction <add>, %12, %cst_6 [1] : vector<16x32xf32> to vector<16xf32>
    %14 = vector.shape_cast %13 : vector<16xf32> to vector<16x1xf32>
    %cst_7 = arith.constant 0.0322580636 : f32
    %15 = vector.broadcast %cst_7 : f32 to vector<16x1xf32>
    %16 = arith.mulf %14, %15 : vector<16x1xf32>
    %17 = math.sqrt %16 : vector<16x1xf32>
    %18 = vector.extract_strided_slice %5 {offsets = [0, 0], sizes = [1, 32], strides = [1, 1]} : vector<2x32xf32> to vector<1x32xf32>
    %19 = vector.broadcast %18 : vector<1x32xf32> to vector<16x32xf32>
    %20 = arith.mulf %19, %11 : vector<16x32xf32>
    %cst_8 = arith.constant 9.99999997E-7 : f32
    %21 = vector.broadcast %cst_8 : f32 to vector<16x1xf32>
    %22 = arith.addf %17, %21 : vector<16x1xf32>
    %23 = vector.broadcast %22 : vector<16x1xf32> to vector<16x32xf32>
    %24 = arith.divf %20, %23 : vector<16x32xf32>
    %25 = vector.extract_strided_slice %5 {offsets = [1, 0], sizes = [1, 32], strides = [1, 1]} : vector<2x32xf32> to vector<1x32xf32>
    %26 = vector.broadcast %25 : vector<1x32xf32> to vector<16x32xf32>
    %27 = arith.addf %24, %26 : vector<16x32xf32>
    %c0_9 = arith.constant 0 : index
    %c0_10 = arith.constant 0 : index
    %c0_11 = arith.constant 0 : index
    %28 = vector.load %arg4[%c0_9, %c0_10, %c0_11] : memref<1x32x96xf32, #tpu.memory_space<vmem>>, vector<1x32x96xf32>
    %29 = vector.shape_cast %28 : vector<1x32x96xf32> to vector<32x96xf32>
    %cst_12 = arith.constant dense<0.000000e+00> : vector<16x96xf32>
    %30 = tpu.matmul %27, %29, %cst_12 {dimension_numbers = #tpu.dot_dimension_numbers<[1], [0], [0], [1], [0, 0, 1, 1], [], []>} : vector<16x32xf32>, vector<32x96xf32>, vector<16x96xf32> -> vector<16x96xf32>
    %c0_13 = arith.constant 0 : index
    %c0_14 = arith.constant 0 : index
    %c0_15 = arith.constant 0 : index
    %31 = vector.load %arg5[%c0_13, %c0_14, %c0_15] : memref<1x1x96xf32, #tpu.memory_space<vmem>>, vector<1x1x96xf32>
    %32 = vector.shape_cast %31 : vector<1x1x96xf32> to vector<1x96xf32>
    %33 = vector.broadcast %32 : vector<1x96xf32> to vector<16x96xf32>
    %34 = arith.addf %30, %33 : vector<16x96xf32>
    %c0_16 = arith.constant 0 : index
    %c0_17 = arith.constant 0 : index
    %c0_18 = arith.constant 0 : index
    %35 = vector.load %arg2[%c0_16, %c0_17, %c0_18] : memref<2x1x8xf32, #tpu.memory_space<vmem>>, vector<2x1x8xf32>
    %36 = vector.extract_strided_slice %34 {offsets = [0, 0], sizes = [16, 8], strides = [1, 1]} : vector<16x96xf32> to vector<16x8xf32>
    %37 = vector.shape_cast %36 : vector<16x8xf32> to vector<2x8x8xf32>
    %38 = vector.extract_strided_slice %34 {offsets = [0, 32], sizes = [16, 8], strides = [1, 1]} : vector<16x96xf32> to vector<16x8xf32>
    %39 = vector.shape_cast %38 : vector<16x8xf32> to vector<2x8x8xf32>
    %40 = vector.extract_strided_slice %34 {offsets = [0, 64], sizes = [16, 8], strides = [1, 1]} : vector<16x96xf32> to vector<16x8xf32>
    %41 = vector.shape_cast %40 : vector<16x8xf32> to vector<2x8x8xf32>
    "tpu.trace_start"() <{level = 10 : i32, message = "bqd,bkd->bqk"}> : () -> ()
    %cst_19 = arith.constant dense<0.000000e+00> : vector<2x8x8xf32>
    %42 = tpu.matmul %37, %39, %cst_19 {dimension_numbers = #tpu.dot_dimension_numbers<[2], [2], [1], [1], [0, 0, 0, 1, 1, 1], [0], [0]>} : vector<2x8x8xf32>, vector<2x8x8xf32>, vector<2x8x8xf32> -> vector<2x8x8xf32>
    "tpu.trace_stop"() : () -> ()
    %43 = vector.broadcast %35 : vector<2x1x8xf32> to vector<2x8x8xf32>
    %44 = arith.addf %42, %43 : vector<2x8x8xf32>
    %cst_20 = arith.constant dense<0xFF800000> : vector<2x8xf32>
    %45 = vector.multi_reduction <maximumf>, %44, %cst_20 [2] : vector<2x8x8xf32> to vector<2x8xf32>
    %46 = vector.shape_cast %45 : vector<2x8xf32> to vector<2x8x1xf32>
    %47 = vector.broadcast %46 : vector<2x8x1xf32> to vector<2x8x8xf32>
    %48 = arith.subf %44, %47 : vector<2x8x8xf32>
    %49 = math.exp %48 : vector<2x8x8xf32>
    %cst_21 = arith.constant dense<0.000000e+00> : vector<2x8xf32>
    %50 = vector.multi_reduction <add>, %49, %cst_21 [2] : vector<2x8x8xf32> to vector<2x8xf32>
    %51 = vector.shape_cast %50 : vector<2x8xf32> to vector<2x8x1xf32>
    %52 = tpu.reciprocal %51 {approx = true} : vector<2x8x1xf32> -> vector<2x8x1xf32>
    %53 = vector.broadcast %52 : vector<2x8x1xf32> to vector<2x8x8xf32>
    %54 = arith.mulf %49, %53 : vector<2x8x8xf32>
    "tpu.trace_start"() <{level = 10 : i32, message = "bqk,bkd->bqd"}> : () -> ()
    %cst_22 = arith.constant dense<0.000000e+00> : vector<2x8x8xf32>
    %55 = tpu.matmul %54, %41, %cst_22 {dimension_numbers = #tpu.dot_dimension_numbers<[2], [1], [1], [2], [0, 0, 0, 1, 1, 2], [0], [0]>} : vector<2x8x8xf32>, vector<2x8x8xf32>, vector<2x8x8xf32> -> vector<2x8x8xf32>
    "tpu.trace_stop"() : () -> ()
    %56 = vector.shape_cast %55 : vector<2x8x8xf32> to vector<16x8xf32>
    %57 = vector.extract_strided_slice %34 {offsets = [0, 8], sizes = [16, 8], strides = [1, 1]} : vector<16x96xf32> to vector<16x8xf32>
    %58 = vector.shape_cast %57 : vector<16x8xf32> to vector<2x8x8xf32>
    %59 = vector.extract_strided_slice %34 {offsets = [0, 40], sizes = [16, 8], strides = [1, 1]} : vector<16x96xf32> to vector<16x8xf32>
    %60 = vector.shape_cast %59 : vector<16x8xf32> to vector<2x8x8xf32>
    %61 = vector.extract_strided_slice %34 {offsets = [0, 72], sizes = [16, 8], strides = [1, 1]} : vector<16x96xf32> to vector<16x8xf32>
    %62 = vector.shape_cast %61 : vector<16x8xf32> to vector<2x8x8xf32>
    "tpu.trace_start"() <{level = 10 : i32, message = "bqd,bkd->bqk"}> : () -> ()
    %cst_23 = arith.constant dense<0.000000e+00> : vector<2x8x8xf32>
    %63 = tpu.matmul %58, %60, %cst_23 {dimension_numbers = #tpu.dot_dimension_numbers<[2], [2], [1], [1], [0, 0, 0, 1, 1, 1], [0], [0]>} : vector<2x8x8xf32>, vector<2x8x8xf32>, vector<2x8x8xf32> -> vector<2x8x8xf32>
    "tpu.trace_stop"() : () -> ()
    %64 = vector.broadcast %35 : vector<2x1x8xf32> to vector<2x8x8xf32>
    %65 = arith.addf %63, %64 : vector<2x8x8xf32>
    %cst_24 = arith.constant dense<0xFF800000> : vector<2x8xf32>
    %66 = vector.multi_reduction <maximumf>, %65, %cst_24 [2] : vector<2x8x8xf32> to vector<2x8xf32>
    %67 = vector.shape_cast %66 : vector<2x8xf32> to vector<2x8x1xf32>
    %68 = vector.broadcast %67 : vector<2x8x1xf32> to vector<2x8x8xf32>
    %69 = arith.subf %65, %68 : vector<2x8x8xf32>
    %70 = math.exp %69 : vector<2x8x8xf32>
    %cst_25 = arith.constant dense<0.000000e+00> : vector<2x8xf32>
    %71 = vector.multi_reduction <add>, %70, %cst_25 [2] : vector<2x8x8xf32> to vector<2x8xf32>
    %72 = vector.shape_cast %71 : vector<2x8xf32> to vector<2x8x1xf32>
    %73 = tpu.reciprocal %72 {approx = true} : vector<2x8x1xf32> -> vector<2x8x1xf32>
    %74 = vector.broadcast %73 : vector<2x8x1xf32> to vector<2x8x8xf32>
    %75 = arith.mulf %70, %74 : vector<2x8x8xf32>
    "tpu.trace_start"() <{level = 10 : i32, message = "bqk,bkd->bqd"}> : () -> ()
    %cst_26 = arith.constant dense<0.000000e+00> : vector<2x8x8xf32>
    %76 = tpu.matmul %75, %62, %cst_26 {dimension_numbers = #tpu.dot_dimension_numbers<[2], [1], [1], [2], [0, 0, 0, 1, 1, 2], [0], [0]>} : vector<2x8x8xf32>, vector<2x8x8xf32>, vector<2x8x8xf32> -> vector<2x8x8xf32>
    "tpu.trace_stop"() : () -> ()
    %77 = vector.shape_cast %76 : vector<2x8x8xf32> to vector<16x8xf32>
    %78 = vector.extract_strided_slice %34 {offsets = [0, 16], sizes = [16, 8], strides = [1, 1]} : vector<16x96xf32> to vector<16x8xf32>
    %79 = vector.shape_cast %78 : vector<16x8xf32> to vector<2x8x8xf32>
    %80 = vector.extract_strided_slice %34 {offsets = [0, 48], sizes = [16, 8], strides = [1, 1]} : vector<16x96xf32> to vector<16x8xf32>
    %81 = vector.shape_cast %80 : vector<16x8xf32> to vector<2x8x8xf32>
    %82 = vector.extract_strided_slice %34 {offsets = [0, 80], sizes = [16, 8], strides = [1, 1]} : vector<16x96xf32> to vector<16x8xf32>
    %83 = vector.shape_cast %82 : vector<16x8xf32> to vector<2x8x8xf32>
    "tpu.trace_start"() <{level = 10 : i32, message = "bqd,bkd->bqk"}> : () -> ()
    %cst_27 = arith.constant dense<0.000000e+00> : vector<2x8x8xf32>
    %84 = tpu.matmul %79, %81, %cst_27 {dimension_numbers = #tpu.dot_dimension_numbers<[2], [2], [1], [1], [0, 0, 0, 1, 1, 1], [0], [0]>} : vector<2x8x8xf32>, vector<2x8x8xf32>, vector<2x8x8xf32> -> vector<2x8x8xf32>
    "tpu.trace_stop"() : () -> ()
    %85 = vector.broadcast %35 : vector<2x1x8xf32> to vector<2x8x8xf32>
    %86 = arith.addf %84, %85 : vector<2x8x8xf32>
    %cst_28 = arith.constant dense<0xFF800000> : vector<2x8xf32>
    %87 = vector.multi_reduction <maximumf>, %86, %cst_28 [2] : vector<2x8x8xf32> to vector<2x8xf32>
    %88 = vector.shape_cast %87 : vector<2x8xf32> to vector<2x8x1xf32>
    %89 = vector.broadcast %88 : vector<2x8x1xf32> to vector<2x8x8xf32>
    %90 = arith.subf %86, %89 : vector<2x8x8xf32>
    %91 = math.exp %90 : vector<2x8x8xf32>
    %cst_29 = arith.constant dense<0.000000e+00> : vector<2x8xf32>
    %92 = vector.multi_reduction <add>, %91, %cst_29 [2] : vector<2x8x8xf32> to vector<2x8xf32>
    %93 = vector.shape_cast %92 : vector<2x8xf32> to vector<2x8x1xf32>
    %94 = tpu.reciprocal %93 {approx = true} : vector<2x8x1xf32> -> vector<2x8x1xf32>
    %95 = vector.broadcast %94 : vector<2x8x1xf32> to vector<2x8x8xf32>
    %96 = arith.mulf %91, %95 : vector<2x8x8xf32>
    "tpu.trace_start"() <{level = 10 : i32, message = "bqk,bkd->bqd"}> : () -> ()
    %cst_30 = arith.constant dense<0.000000e+00> : vector<2x8x8xf32>
    %97 = tpu.matmul %96, %83, %cst_30 {dimension_numbers = #tpu.dot_dimension_numbers<[2], [1], [1], [2], [0, 0, 0, 1, 1, 2], [0], [0]>} : vector<2x8x8xf32>, vector<2x8x8xf32>, vector<2x8x8xf32> -> vector<2x8x8xf32>
    "tpu.trace_stop"() : () -> ()
    %98 = vector.shape_cast %97 : vector<2x8x8xf32> to vector<16x8xf32>
    %99 = vector.extract_strided_slice %34 {offsets = [0, 24], sizes = [16, 8], strides = [1, 1]} : vector<16x96xf32> to vector<16x8xf32>
    %100 = vector.shape_cast %99 : vector<16x8xf32> to vector<2x8x8xf32>
    %101 = vector.extract_strided_slice %34 {offsets = [0, 56], sizes = [16, 8], strides = [1, 1]} : vector<16x96xf32> to vector<16x8xf32>
    %102 = vector.shape_cast %101 : vector<16x8xf32> to vector<2x8x8xf32>
    %103 = vector.extract_strided_slice %34 {offsets = [0, 88], sizes = [16, 8], strides = [1, 1]} : vector<16x96xf32> to vector<16x8xf32>
    %104 = vector.shape_cast %103 : vector<16x8xf32> to vector<2x8x8xf32>
    "tpu.trace_start"() <{level = 10 : i32, message = "bqd,bkd->bqk"}> : () -> ()
    %cst_31 = arith.constant dense<0.000000e+00> : vector<2x8x8xf32>
    %105 = tpu.matmul %100, %102, %cst_31 {dimension_numbers = #tpu.dot_dimension_numbers<[2], [2], [1], [1], [0, 0, 0, 1, 1, 1], [0], [0]>} : vector<2x8x8xf32>, vector<2x8x8xf32>, vector<2x8x8xf32> -> vector<2x8x8xf32>
    "tpu.trace_stop"() : () -> ()
    %106 = vector.broadcast %35 : vector<2x1x8xf32> to vector<2x8x8xf32>
    %107 = arith.addf %105, %106 : vector<2x8x8xf32>
    %cst_32 = arith.constant dense<0xFF800000> : vector<2x8xf32>
    %108 = vector.multi_reduction <maximumf>, %107, %cst_32 [2] : vector<2x8x8xf32> to vector<2x8xf32>
    %109 = vector.shape_cast %108 : vector<2x8xf32> to vector<2x8x1xf32>
    %110 = vector.broadcast %109 : vector<2x8x1xf32> to vector<2x8x8xf32>
    %111 = arith.subf %107, %110 : vector<2x8x8xf32>
    %112 = math.exp %111 : vector<2x8x8xf32>
    %cst_33 = arith.constant dense<0.000000e+00> : vector<2x8xf32>
    %113 = vector.multi_reduction <add>, %112, %cst_33 [2] : vector<2x8x8xf32> to vector<2x8xf32>
    %114 = vector.shape_cast %113 : vector<2x8xf32> to vector<2x8x1xf32>
    %115 = tpu.reciprocal %114 {approx = true} : vector<2x8x1xf32> -> vector<2x8x1xf32>
    %116 = vector.broadcast %115 : vector<2x8x1xf32> to vector<2x8x8xf32>
    %117 = arith.mulf %112, %116 : vector<2x8x8xf32>
    "tpu.trace_start"() <{level = 10 : i32, message = "bqk,bkd->bqd"}> : () -> ()
    %cst_34 = arith.constant dense<0.000000e+00> : vector<2x8x8xf32>
    %118 = tpu.matmul %117, %104, %cst_34 {dimension_numbers = #tpu.dot_dimension_numbers<[2], [1], [1], [2], [0, 0, 0, 1, 1, 2], [0], [0]>} : vector<2x8x8xf32>, vector<2x8x8xf32>, vector<2x8x8xf32> -> vector<2x8x8xf32>
    "tpu.trace_stop"() : () -> ()
    %119 = vector.shape_cast %118 : vector<2x8x8xf32> to vector<16x8xf32>
    %120 = tpu.concatenate %56, %77, %98, %119 in 1 : vector<16x8xf32>, vector<16x8xf32>, vector<16x8xf32>, vector<16x8xf32> -> vector<16x32xf32>
    %c0_35 = arith.constant 0 : index
    %c0_36 = arith.constant 0 : index
    %c0_37 = arith.constant 0 : index
    %121 = vector.load %arg6[%c0_35, %c0_36, %c0_37] : memref<1x32x32xf32, #tpu.memory_space<vmem>>, vector<1x32x32xf32>
    %122 = vector.shape_cast %121 : vector<1x32x32xf32> to vector<32x32xf32>
    %cst_38 = arith.constant dense<0.000000e+00> : vector<16x32xf32>
    %123 = tpu.matmul %120, %122, %cst_38 {dimension_numbers = #tpu.dot_dimension_numbers<[1], [0], [0], [1], [0, 0, 1, 1], [], []>} : vector<16x32xf32>, vector<32x32xf32>, vector<16x32xf32> -> vector<16x32xf32>
    %c0_39 = arith.constant 0 : index
    %c0_40 = arith.constant 0 : index
    %c0_41 = arith.constant 0 : index
    %124 = vector.load %arg7[%c0_39, %c0_40, %c0_41] : memref<1x1x32xf32, #tpu.memory_space<vmem>>, vector<1x1x32xf32>
    %125 = vector.shape_cast %124 : vector<1x1x32xf32> to vector<1x32xf32>
    %126 = vector.broadcast %125 : vector<1x32xf32> to vector<16x32xf32>
    %127 = arith.addf %123, %126 : vector<16x32xf32>
    %128 = arith.addf %3, %127 : vector<16x32xf32>
    %c0_42 = arith.constant 0 : index
    %c0_43 = arith.constant 0 : index
    %c0_44 = arith.constant 0 : index
    %129 = vector.load %arg8[%c0_42, %c0_43, %c0_44] : memref<1x2x32xf32, #tpu.memory_space<vmem>>, vector<1x2x32xf32>
    %130 = vector.shape_cast %129 : vector<1x2x32xf32> to vector<2x32xf32>
    %cst_45 = arith.constant dense<0.000000e+00> : vector<16xf32>
    %131 = vector.multi_reduction <add>, %128, %cst_45 [1] : vector<16x32xf32> to vector<16xf32>
    %132 = vector.shape_cast %131 : vector<16xf32> to vector<16x1xf32>
    %cst_46 = arith.constant 3.200000e+01 : f32
    %133 = vector.broadcast %cst_46 : f32 to vector<16x1xf32>
    %134 = arith.divf %132, %133 : vector<16x1xf32>
    %135 = vector.broadcast %134 : vector<16x1xf32> to vector<16x32xf32>
    %136 = arith.subf %128, %135 : vector<16x32xf32>
    %137 = arith.mulf %136, %136 : vector<16x32xf32>
    %cst_47 = arith.constant dense<0.000000e+00> : vector<16xf32>
    %138 = vector.multi_reduction <add>, %137, %cst_47 [1] : vector<16x32xf32> to vector<16xf32>
    %139 = vector.shape_cast %138 : vector<16xf32> to vector<16x1xf32>
    %cst_48 = arith.constant 0.0322580636 : f32
    %140 = vector.broadcast %cst_48 : f32 to vector<16x1xf32>
    %141 = arith.mulf %139, %140 : vector<16x1xf32>
    %142 = math.sqrt %141 : vector<16x1xf32>
    %143 = vector.extract_strided_slice %130 {offsets = [0, 0], sizes = [1, 32], strides = [1, 1]} : vector<2x32xf32> to vector<1x32xf32>
    %144 = vector.broadcast %143 : vector<1x32xf32> to vector<16x32xf32>
    %145 = arith.mulf %144, %136 : vector<16x32xf32>
    %cst_49 = arith.constant 9.99999997E-7 : f32
    %146 = vector.broadcast %cst_49 : f32 to vector<16x1xf32>
    %147 = arith.addf %142, %146 : vector<16x1xf32>
    %148 = vector.broadcast %147 : vector<16x1xf32> to vector<16x32xf32>
    %149 = arith.divf %145, %148 : vector<16x32xf32>
    %150 = vector.extract_strided_slice %130 {offsets = [1, 0], sizes = [1, 32], strides = [1, 1]} : vector<2x32xf32> to vector<1x32xf32>
    %151 = vector.broadcast %150 : vector<1x32xf32> to vector<16x32xf32>
    %152 = arith.addf %149, %151 : vector<16x32xf32>
    %c0_50 = arith.constant 0 : index
    %c0_51 = arith.constant 0 : index
    %c0_52 = arith.constant 0 : index
    %153 = vector.load %arg9[%c0_50, %c0_51, %c0_52] : memref<1x32x64xf32, #tpu.memory_space<vmem>>, vector<1x32x64xf32>
    %154 = vector.shape_cast %153 : vector<1x32x64xf32> to vector<32x64xf32>
    %cst_53 = arith.constant dense<0.000000e+00> : vector<16x64xf32>
    %155 = tpu.matmul %152, %154, %cst_53 {dimension_numbers = #tpu.dot_dimension_numbers<[1], [0], [0], [1], [0, 0, 1, 1], [], []>} : vector<16x32xf32>, vector<32x64xf32>, vector<16x64xf32> -> vector<16x64xf32>
    %c0_54 = arith.constant 0 : index
    %c0_55 = arith.constant 0 : index
    %c0_56 = arith.constant 0 : index
    %156 = vector.load %arg10[%c0_54, %c0_55, %c0_56] : memref<1x1x64xf32, #tpu.memory_space<vmem>>, vector<1x1x64xf32>
    %157 = vector.shape_cast %156 : vector<1x1x64xf32> to vector<1x64xf32>
    %158 = vector.broadcast %157 : vector<1x64xf32> to vector<16x64xf32>
    %159 = arith.addf %155, %158 : vector<16x64xf32>
    %cst_57 = arith.constant 0.000000e+00 : f32
    %160 = vector.broadcast %cst_57 : f32 to vector<16x64xf32>
    %161 = arith.maximumf %159, %160 : vector<16x64xf32>
    %c0_58 = arith.constant 0 : index
    %c0_59 = arith.constant 0 : index
    %c0_60 = arith.constant 0 : index
    %162 = vector.load %arg11[%c0_58, %c0_59, %c0_60] : memref<1x64x32xf32, #tpu.memory_space<vmem>>, vector<1x64x32xf32>
    %163 = vector.shape_cast %162 : vector<1x64x32xf32> to vector<64x32xf32>
    %cst_61 = arith.constant dense<0.000000e+00> : vector<16x32xf32>
    %164 = tpu.matmul %161, %163, %cst_61 {dimension_numbers = #tpu.dot_dimension_numbers<[1], [0], [0], [1], [0, 0, 1, 1], [], []>} : vector<16x64xf32>, vector<64x32xf32>, vector<16x32xf32> -> vector<16x32xf32>
    %c0_62 = arith.constant 0 : index
    %c0_63 = arith.constant 0 : index
    %c0_64 = arith.constant 0 : index
    %165 = vector.load %arg12[%c0_62, %c0_63, %c0_64] : memref<1x1x32xf32, #tpu.memory_space<vmem>>, vector<1x1x32xf32>
    %166 = vector.shape_cast %165 : vector<1x1x32xf32> to vector<1x32xf32>
    %167 = vector.broadcast %166 : vector<1x32xf32> to vector<16x32xf32>
    %168 = arith.addf %164, %167 : vector<16x32xf32>
    %169 = arith.addf %128, %168 : vector<16x32xf32>
    %c1_i32 = arith.constant 1 : i32
    %170 = arith.cmpi slt, %arg0, %c1_i32 : i32
    %171 = arith.extui %170 : i1 to i32
    %c0_i32_65 = arith.constant 0 : i32
    %172 = arith.cmpi ne, %171, %c0_i32_65 : i32
    scf.if %172 {
      %c0_68 = arith.constant 0 : index
      %c0_69 = arith.constant 0 : index
      %176 = vector.load %arg14[%c0_68, %c0_69] : memref<16x32xf32, #tpu.memory_space<vmem>>, vector<16x32xf32>
      tpu.vector_store %arg14[%c0_68, %c0_69], %169 {strides = array<i32>} : memref<16x32xf32, #tpu.memory_space<vmem>>, vector<16x32xf32>,
    } else {
    }
    %c1_i32_66 = arith.constant 1 : i32
    %173 = arith.cmpi eq, %arg0, %c1_i32_66 : i32
    %174 = arith.extui %173 : i1 to i32
    %c0_i32_67 = arith.constant 0 : i32
    %175 = arith.cmpi ne, %174, %c0_i32_67 : i32
    scf.if %175 {
      %c0_68 = arith.constant 0 : index
      %c0_69 = arith.constant 0 : index
      %c0_70 = arith.constant 0 : index
      %176 = vector.load %arg13[%c0_68, %c0_69, %c0_70] : memref<1x2x32xf32, #tpu.memory_space<vmem>>, vector<1x2x32xf32>
      %177 = vector.shape_cast %176 : vector<1x2x32xf32> to vector<2x32xf32>
      %cst_71 = arith.constant dense<0.000000e+00> : vector<16xf32>
      %178 = vector.multi_reduction <add>, %169, %cst_71 [1] : vector<16x32xf32> to vector<16xf32>
      %179 = vector.shape_cast %178 : vector<16xf32> to vector<16x1xf32>
      %cst_72 = arith.constant 3.200000e+01 : f32
      %180 = vector.broadcast %cst_72 : f32 to vector<16x1xf32>
      %181 = arith.divf %179, %180 : vector<16x1xf32>
      %182 = vector.broadcast %181 : vector<16x1xf32> to vector<16x32xf32>
      %183 = arith.subf %169, %182 : vector<16x32xf32>
      %184 = arith.mulf %183, %183 : vector<16x32xf32>
      %cst_73 = arith.constant dense<0.000000e+00> : vector<16xf32>
      %185 = vector.multi_reduction <add>, %184, %cst_73 [1] : vector<16x32xf32> to vector<16xf32>
      %186 = vector.shape_cast %185 : vector<16xf32> to vector<16x1xf32>
      %cst_74 = arith.constant 0.0322580636 : f32
      %187 = vector.broadcast %cst_74 : f32 to vector<16x1xf32>
      %188 = arith.mulf %186, %187 : vector<16x1xf32>
      %189 = math.sqrt %188 : vector<16x1xf32>
      %190 = vector.extract_strided_slice %177 {offsets = [0, 0], sizes = [1, 32], strides = [1, 1]} : vector<2x32xf32> to vector<1x32xf32>
      %191 = vector.broadcast %190 : vector<1x32xf32> to vector<16x32xf32>
      %192 = arith.mulf %191, %183 : vector<16x32xf32>
      %cst_75 = arith.constant 9.99999997E-7 : f32
      %193 = vector.broadcast %cst_75 : f32 to vector<16x1xf32>
      %194 = arith.addf %189, %193 : vector<16x1xf32>
      %195 = vector.broadcast %194 : vector<16x1xf32> to vector<16x32xf32>
      %196 = arith.divf %192, %195 : vector<16x32xf32>
      %197 = vector.extract_strided_slice %177 {offsets = [1, 0], sizes = [1, 32], strides = [1, 1]} : vector<2x32xf32> to vector<1x32xf32>
      %198 = vector.broadcast %197 : vector<1x32xf32> to vector<16x32xf32>
      %199 = arith.addf %196, %198 : vector<16x32xf32>
      %c0_76 = arith.constant 0 : index
      %c0_77 = arith.constant 0 : index
      %200 = vector.load %arg14[%c0_76, %c0_77] : memref<16x32xf32, #tpu.memory_space<vmem>>, vector<16x32xf32>
      tpu.vector_store %arg14[%c0_76, %c0_77], %199 {strides = array<i32>} : memref<16x32xf32, #tpu.memory_space<vmem>>, vector<16x32xf32>,
    } else {
    }
    return
  }
  func.func @transform_0(%arg0: i32) -> (i32, i32) {
    %c0_i32 = arith.constant 0 : i32
    %c0_i32_0 = arith.constant 0 : i32
    %c0_i32_1 = arith.constant 0 : i32
    return %c0_i32, %c0_i32_0 : i32, i32
  }
  func.func @transform_1(%arg0: i32) -> (i32, i32, i32) {
    %c0_i32 = arith.constant 0 : i32
    %c0_i32_0 = arith.constant 0 : i32
    %c0_i32_1 = arith.constant 0 : i32
    %c0_i32_2 = arith.constant 0 : i32
    return %c0_i32, %c0_i32_0, %c0_i32_1 : i32, i32, i32
  }
  func.func @transform_2(%arg0: i32) -> (i32, i32, i32) {
    %c0_i32 = arith.constant 0 : i32
    %c0_i32_0 = arith.constant 0 : i32
    %c0_i32_1 = arith.constant 0 : i32
    return %arg0, %c0_i32, %c0_i32_0 : i32, i32, i32
  }
  func.func @transform_3(%arg0: i32) -> (i32, i32, i32) {
    %c0_i32 = arith.constant 0 : i32
    %c0_i32_0 = arith.constant 0 : i32
    %c0_i32_1 = arith.constant 0 : i32
    return %arg0, %c0_i32, %c0_i32_0 : i32, i32, i32
  }
  func.func @transform_4(%arg0: i32) -> (i32, i32, i32) {
    %c0_i32 = arith.constant 0 : i32
    %c0_i32_0 = arith.constant 0 : i32
    %c0_i32_1 = arith.constant 0 : i32
    return %arg0, %c0_i32, %c0_i32_0 : i32, i32, i32
  }
  func.func @transform_5(%arg0: i32) -> (i32, i32, i32) {
    %c0_i32 = arith.constant 0 : i32
    %c0_i32_0 = arith.constant 0 : i32
    %c0_i32_1 = arith.constant 0 : i32
    return %arg0, %c0_i32, %c0_i32_0 : i32, i32, i32
  }
  func.func @transform_6(%arg0: i32) -> (i32, i32, i32) {
    %c0_i32 = arith.constant 0 : i32
    %c0_i32_0 = arith.constant 0 : i32
    %c0_i32_1 = arith.constant 0 : i32
    return %arg0, %c0_i32, %c0_i32_0 : i32, i32, i32
  }
  func.func @transform_7(%arg0: i32) -> (i32, i32, i32) {
    %c0_i32 = arith.constant 0 : i32
    %c0_i32_0 = arith.constant 0 : i32
    %c0_i32_1 = arith.constant 0 : i32
    return %arg0, %c0_i32, %c0_i32_0 : i32, i32, i32
  }
  func.func @transform_8(%arg0: i32) -> (i32, i32, i32) {
    %c0_i32 = arith.constant 0 : i32
    %c0_i32_0 = arith.constant 0 : i32
    %c0_i32_1 = arith.constant 0 : i32
    return %arg0, %c0_i32, %c0_i32_0 : i32, i32, i32
  }
  func.func @transform_9(%arg0: i32) -> (i32, i32, i32) {
    %c0_i32 = arith.constant 0 : i32
    %c0_i32_0 = arith.constant 0 : i32
    %c0_i32_1 = arith.constant 0 : i32
    return %arg0, %c0_i32, %c0_i32_0 : i32, i32, i32
  }
  func.func @transform_10(%arg0: i32) -> (i32, i32, i32) {
    %c0_i32 = arith.constant 0 : i32
    %c0_i32_0 = arith.constant 0 : i32
    %c0_i32_1 = arith.constant 0 : i32
    return %arg0, %c0_i32, %c0_i32_0 : i32, i32, i32
  }
  func.func @transform_11(%arg0: i32) -> (i32, i32, i32) {
    %c0_i32 = arith.constant 0 : i32
    %c0_i32_0 = arith.constant 0 : i32
    %c0_i32_1 = arith.constant 0 : i32
    return %arg0, %c0_i32, %c0_i32_0 : i32, i32, i32
  }
  func.func @transform_12(%arg0: i32) -> (i32, i32, i32) {
    %c0_i32 = arith.constant 0 : i32
    %c0_i32_0 = arith.constant 0 : i32
    %c0_i32_1 = arith.constant 0 : i32
    %c0_i32_2 = arith.constant 0 : i32
    return %c0_i32, %c0_i32_0, %c0_i32_1 : i32, i32, i32
  }
  func.func @transform_13(%arg0: i32) -> (i32, i32) {
    %c0_i32 = arith.constant 0 : i32
    %c0_i32_0 = arith.constant 0 : i32
    %c0_i32_1 = arith.constant 0 : i32
    return %c0_i32, %c0_i32_0 : i32, i32
  }
}

</mosaic_0001>

<bundles_post_ra>
// kernel: tpu_custom_call.1
= control target key start
LH: loop header
LB: loop body
LE: loop exit
PB: predicated region body
PF: predicated region fallthrough
CT: control target
= control target key end

     0   :  { %s3617_s0 = inlined_call_operand.hbm [shape: f32[16,32], index: 0, kind: input, shape index: {}]   ;;  %s3618_s1 = inlined_call_operand.vmem [shape: f32[2,1,8], index: 1, kind: input, shape index: {}]   ;;  %s3619_s2 = inlined_call_operand.vmem [shape: f32[2,2,32], index: 2, kind: input, shape index: {}]   ;;  %s3620_s3 = inlined_call_operand.vmem [shape: f32[2,32,96], index: 3, kind: input, shape index: {}]   ;;  %s3621_s4 = inlined_call_operand.vmem [shape: f32[2,1,96], index: 4, kind: input, shape index: {}]   ;;  %s3622_s5 = inlined_call_operand.vmem [shape: f32[2,32,32], index: 5, kind: input, shape index: {}]   ;;  %s3623_s6 = inlined_call_operand.vmem [shape: f32[2,1,32], index: 6, kind: input, shape index: {}]   ;;  %s3624_s7 = inlined_call_operand.vmem [shape: f32[2,2,32], index: 7, kind: input, shape index: {}]   ;;  %s3625_s8 = inlined_call_operand.vmem [shape: f32[2,32,64], index: 8, kind: input, shape index: {}]   ;;  %s3626_s9 = inlined_call_operand.vmem [shape: f32[2,1,64], index: 9, kind: input, shape index: {}]   ;;  %s3627_s10 = inlined_call_operand.vmem [shape: f32[2,64,32], index: 10, kind: input, shape index: {}]   ;;  %s3628_s11 = inlined_call_operand.vmem [shape: f32[2,1,32], index: 11, kind: input, shape index: {}]   ;;  %s3629_s12 = inlined_call_operand.vmem [shape: f32[1,2,32], index: 12, kind: input, shape index: {}]   ;;  %s3630_s13 = inlined_call_operand.hbm [shape: f32[16,32], index: 13, kind: output, shape index: {}]  }
   0x1   :  { %3635 = sst [smem:[#allocation9_spill]] %s3617_s0 }
   0x2   :  { %3636 = sst [smem:[#allocation10_spill]] %s3619_s2 }
   0x3   :  { %3637 = sst [smem:[#allocation11_spill]] %s3620_s3 }
   0x4   :  { %3638 = sst [smem:[#allocation12_spill]] %s3622_s5 }
   0x5   :  { %3639 = sst [smem:[#allocation13_spill]] %s3630_s13 }
   0x6   :  { %18 = vsyncpa [#allocation3], 0 }
   0x7   :  { %19 = vsyncpa [#allocation4], 0  ;;  %s3235_s25 = smov 0  }
   0x8 LB: > { %3640 = sst [smem:[#allocation8_spill]] %s3142_s25  ;;  %s3241_s26 = sadd.s32 4294967295, %s3142_s25   ;;  %s3142_s25 = sphi %s3235_s25, %s25_s25  }
   0x9   : > { %p2677_p0 = scmp.ge.s32.totalorder %s3142_s25, 1  ;;  %p374_p1 = scmp.lt.s32.totalorder %s3142_s25, 3 }
   0xa   : > { %s3144_s27 = smov [#allocation2]   ;;  %p3631_p4 = scmp.eq.s32.totalorder %s3241_s26, 0 }
   0xb   : > { %s386_s28 = sshll.u32 %s3144_s27, 4  ;;  %p3246_p3 = pnand %p2677_p0, %p374_p1  ;;  %s387_s28 = int_to_ptr.vmem [resolvable:$true] %s386_s28 }
   0xc   : > { %s3643_s0 = sld [smem:[#allocation9_spill]] }
   0xd   : > { %s3641_s29 = scalar_select %p3246_p3, 1, 0 }
   0xe   : > { %p2981_p5 = pneg %p3246_p3 }
  0x10   : > { %p3255_p6 = pnand %p3631_p4, %p2981_p5 }
  0x12   : > { %s3074_s16 = scalar_lea.hbm %s3643_s0, 256  ;;  %p3076_p8 = pneg %p3255_p6 }
  0x13   : > { %p3075_p7 = scmp.ne.s32.totalorder %s3643_s0, %s3074_s16  ;;  %p3081_p11 = scmp.lt.u32.totalorder %s3074_s16, %s3643_s0 }
  0x15   : > { %p3077_p9 = pnand %p3076_p8, %p3075_p7 }
  0x17   : > { %p3078_p10 = pneg %p3077_p9 }
  0x19   : > { %p3083_p12 = pnand %p3081_p11, %p3078_p10 }
  0x1b   : > { %3086 = shalt.err (!%p3083_p12)
}
  0x1c   : > { %s3087_s21 = scalar_lea.vmem %s387_s28, 256  ;;  %p3095_p5 = scmp.lt.s32.totalorder %s387_s28, %s387_s28 }
  0x1d   : > { %p3088_p13 = scmp.ne.s32.totalorder %s387_s28, %s3087_s21  ;;  %p3096_p2 = scmp.lt.s32.totalorder %s3087_s21, %s3087_s21 }
  0x1f   : > { %p3090_p0 = pnand %p3088_p13, %p3076_p8  ;;  %p3097_p4 = por %p3096_p2, %p3095_p5 }
  0x21   : > { %p3091_p1 = pneg %p3090_p0 }
  0x23   : > { %p3098_p3 = pnand %p3097_p4, %p3091_p1 }
  0x25   : > { %3101 = shalt.err (!%p3098_p3)
}
  0x26   : > { %s3145_s22 = smov 128   ;;  %s3146_s23 = smov 8  }
  0x27   : > { %2984 = dma.hbm_to_vmem [thread:$0]  (!%p3255_p6), %s3643_s0, 256, %s387_s28, [#allocation3], %s3145_s22, %s3145_s22, %s3146_s23  }
  0x28   : > { %p3644_p7 = scmp.ne.s32.totalorder %s3641_s29, 0 }
  0x29   : > { %p3645_p9 = scmp.eq.s32.totalorder (!%p3644_p7), %s3241_s26, 0 }
  0x2a   : > { %478 = sbr.rel (%p3644_p7) target bundleno = 4533 (0x11b5), region = 72 }
  0x31   : > { %3133 = dma.done.wait (%p3645_p9), [#allocation3], 256   ;;  %p3646_p8 = pmov %p3645_p9 }
  0x32   : > { %p552_p2 = scmp.lt.s32.totalorder %s3241_s26, 1  ;;  %s3647_s2 = sld [smem:[#allocation10_spill]] }
  0x33   : > { %3135 = vsyncadd (%p3646_p8), [#allocation3], 4294967040  ;;  %s3648_s3 = sld [smem:[#allocation11_spill]]  ;;  %s3649_s5 = sld [smem:[#allocation12_spill]] }
  0x34   : > { %s3283_s14 = scalar_select %p552_p2, %s3241_s26, 1 }
  0x35   : > { %p3650_p3 = scmp.ne.s32.totalorder %s3241_s26, 0 }
  0x36   : > { %s2682_s28 = sshll.u32 %s3283_s14, 1  ;;  %s2737_s29 = sshll.u32 %s3283_s14, 5  ;;  %v596_v0 = vld [vmem:[#allocation2] sm:$0xff] (!%p3650_p3)  ;;  %vm598_vm0 = vcmask (!%p3650_p3), 261120   ;;  %v597_v1 = vld [vmem:[#allocation2 + $0x8] sm:$0xff] (!%p3650_p3) }
  0x37   : > { %s3313_s13 = scalar_lea.vmem %s3624_s7, %s2682_s28  ;;  %s583_s23 = scalar_lea.vmem %s3626_s9, %s3283_s14  ;;  %599 = vst.msk [vmem:[#allocation5] sm:$0xff] (!%p3650_p3), %vm598_vm0, %v596_v0  ;;  %600 = vst.msk [vmem:[#allocation5 + $0x8] sm:$0xff] (!%p3650_p3), %vm598_vm0, %v597_v1 }
  0x38   : > { %s3290_s16 = scalar_lea.vmem %s3647_s2, %s2682_s28  ;;  %s2740_s24 = sshll.u32 %s3283_s14, 6 }
  0x39   : > { %s3295_s19 = scalar_lea.vmem %s3648_s3, %s2737_s29  ;;  %s3304_s27 = scalar_lea.vmem %s3649_s5, %s2737_s29 }
  0x3a   : > { %s3318_s3 = scalar_lea.vmem %s3625_s8, %s2737_s29  ;;  %s591_s0 = scalar_lea.vmem %s3628_s11, %s3283_s14 }
  0x3b   : > { %s3332_s2 = scalar_lea.vmem %s3627_s10, %s2740_s24  ;;  %595 = sbr.rel (%p3650_p3) target bundleno = 66 (0x42), region = 80 }
  0x42 PF: > { %v3336_v2 = vld [vmem:[#allocation5] sm:$0xff]  ;;  %vm604_vm1 = vcmask 261120   ;;  %v3338_v3 = vld [vmem:[#allocation5 + $0x8] sm:$0xff]  ;;  %v658_v16 = vld [vmem:[%s3295_s19] sm:$0xff]  ;;  %v640_v27 = vlaneseq  ;;  %v3147_v53 = vmov 0.0   ;;  %vm3148_vm6 = vmmov 0   ;;  %s3651_s29 = scalar_lea.vmem %s3621_s4, %s3283_s14 }
  0x43   : > { %v605_v4 = vsel %vm604_vm1, %v3336_v2, 0.0  ;;  %v608_v5 = vsel %vm604_vm1, %v3338_v3, 0.0  ;;  %v659_v17 = vld [vmem:[%s3295_s19 + $0x8] sm:$0xff]  ;;  %v660_v18 = vld [vmem:[%s3295_s19 + $0x10] sm:$0xff]  ;;  %v661_v20 = vld [vmem:[%s3295_s19 + $0x18] sm:$0xff]  ;;  %2822 = vmatprep.subr.mxu0 %v3147_v53  ;;  %2824 = vmatprep.mubr.msk.f32.mxu0 %vm3148_vm6, %v3147_v53  ;;  %vm767_vm7 = vcmask 64512  }
  0x44   : > { %606 = vadd.xlane.f32.xlu0 %v605_v4  ;;  %v2933_v19 = vpack.c.bf16 %v659_v17, %v658_v16  ;;  %v2937_v21 = vpack.c.bf16 %v661_v20, %v660_v18  ;;  %v641_v32 = vshrl.u32 %v640_v27, 7  ;;  %v603_v40 = vld [vmem:[%s3290_s16] sm:$0x3]  ;;  %s3149_s16 = smov 96   ;;  %s3150_s17 = smov 64   ;;  %vm2112_vm8 = vcmask 195584  }
  0x45   : > { %v2693_v54 = vld [vmem:[%s3651_s29] ss:$0 sm:$0xff]  ;;  %v3399_v1 = vld [vmem:[%s3618_s1 + $0x1] ss:$0 sm:$0xff]  ;;  %s3151_s18 = smov 88   ;;  %s3152_s20 = smov 120  }
  0x46   : > { %2934 = vmatprep.subr.bf16.mxu1 %v2933_v19  ;;  %v3352_v38 = vsub.s32 0, %v641_v32  ;;  %v3356_v43 = vsub.s32 1, %v641_v32  ;;  %v3393_v61 = vld [vmem:[%s3618_s1] ss:$0 sm:$0xff]  ;;  %s3153_s21 = smov 56   ;;  %s3154_s24 = smov 80  }
  0x47   : > { %2936 = vmatpush3.bf16.msra.mxu1 %v2933_v19  ;;  %s3155_s25 = smov 112   ;;  %s3156_s5 = smov 48   ;;  %vm2109_vm9 = vcmask 130048   ;;  %vm2371_vm14 = vcmask 523264  }
  0x48   : > { %609 = vadd.xlane.f32.xlu0 %v608_v5  ;;  %2938 = vmatprep.subr.bf16.mxu1 %v2937_v21  ;;  %v643_v42 = vrot.slane %v603_v40, %v3352_v38  ;;  %v655_v45 = vrot.slane %v603_v40, %v3356_v43  ;;  %s3157_s28 = smov 72   ;;  %s3158_s29 = smov 104  }
  0x49   : > { %s3160_s19 = smov 8   ;;  %s3161_s22 = smov 16  }
  0x4a   : > { %s3162_s30 = smov 24   ;;  %p2731_p4 = scmp.ge.s32.totalorder %s3241_s26, 1 }
  0x4b   : > { %2940 = vmatpush3.bf16.msra.mxu1 %v2937_v21 }
  0x4c   : > { %2812 = vmatprep.subr.mxu1 %v3147_v53 }
  0xd1   : > { %v607_v6 = vpop.xlane.xlu0 %606 }
  0xd2   : > { %v612_v7 = vmul.f32 0.03125, %v607_v6 }
  0xd4   : > { %v614_v8 = vsub.f32 %v3336_v2, %v612_v7 }
  0xd5   : > { %v610_v9 = vpop.xlane.xlu0 %609 }
  0xd6   : > { %v613_v10 = vmul.f32 0.03125, %v610_v9  ;;  %v616_v11 = vmul.f32 %v614_v8, %v614_v8  ;;  %v644_v44 = vmul.f32 %v643_v42, %v614_v8 }
  0xd8   : > { %v615_v12 = vsub.f32 %v3338_v3, %v613_v10  ;;  %v618_v13 = vsel %vm604_vm1, %v616_v11, 0.0 }
  0xd9   : > { %619 = vadd.xlane.f32.xlu1 %v618_v13 }
  0xda   : > { %v617_v14 = vmul.f32 %v615_v12, %v615_v12  ;;  %v645_v48 = vmul.f32 %v643_v42, %v615_v12 }
  0xdc   : > { %v621_v15 = vsel %vm604_vm1, %v617_v14, 0.0 }
  0xdd   : > { %622 = vadd.xlane.f32.xlu1 %v621_v15 }
 0x166   : > { %v620_v22 = vpop.xlane.xlu1 %619 }
 0x167   : > { %v624_v23 = vmul.f32 0.032258064, %v620_v22 }
 0x169   : > { %3018 = vrsqrt.f32 %v624_v23  ;;  %vm628_vm2 = vcmp.eq.f32.partialorder %v624_v23, inf  ;;  %v631_v29 = vand.u32 2147483648, %v624_v23  ;;  %vm630_vm3 = vcmp.eq.f32.partialorder %v624_v23, 0.0 }
 0x16a   : > { %v623_v24 = vpop.xlane.xlu1 %622 }
 0x16b   : > { %v625_v25 = vmul.f32 0.032258064, %v623_v24 }
 0x16d   : > { %3020 = vrsqrt.f32 %v625_v25  ;;  %vm635_vm4 = vcmp.eq.f32.partialorder %v625_v25, inf  ;;  %v638_v36 = vand.u32 2147483648, %v625_v25  ;;  %vm637_vm5 = vcmp.eq.f32.partialorder %v625_v25, 0.0 }
 0x173   : > { %v3019_v26 = vpop.eup %3018 }
 0x174   : > { %v627_v28 = vmul.f32 %v3019_v26, %v624_v23 }
 0x176   : > { %v629_v30 = vsel %vm628_vm2, %v624_v23, %v627_v28 }
 0x177   : > { %v3021_v31 = vpop.eup %3020  ;;  %v632_v33 = vsel %vm630_vm3, %v631_v29, %v629_v30 }
 0x178   : > { %v634_v34 = vmul.f32 %v3021_v31, %v625_v25  ;;  %v646_v35 = vadd.f32 1e-06, %v632_v33 }
 0x17a   : > { %v636_v37 = vsel %vm635_vm4, %v625_v25, %v634_v34  ;;  %3022 = vrcp.f32 %v646_v35 }
 0x17b   : > { %v639_v39 = vsel %vm637_vm5, %v638_v36, %v636_v37 }
 0x17c   : > { %v647_v41 = vadd.f32 1e-06, %v639_v39 }
 0x17e   : > { %3024 = vrcp.f32 %v647_v41 }
 0x184   : > { %v3023_v46 = vpop.eup %3022 }
 0x185   : > { %v649_v47 = vmul.f32 %v3023_v46, %v644_v44 }
 0x187   : > { %v656_v49 = vadd.f32 %v655_v45, %v649_v47 }
 0x188   : > { %v3025_v50 = vpop.eup %3024 }
 0x189   : > { %v651_v51 = vmul.f32 %v3025_v50, %v645_v48  ;;  %2809 = vmatprep.mubr.msk.f32.mxu1 %vm604_vm1, %v656_v49 }
 0x18b   : > { %v657_v52 = vadd.f32 %v655_v45, %v651_v51 }
 0x18d   : > { %2810 = vmatmul.mubr.msk.f32.vlgmr.msra.gmra.mrb[0].mxu1 %vm604_vm1, %v657_v52 }
 0x18e   : > { %2814 = vmatprep.mubr.msk.f32.mxu1 %vm3148_vm6, %v3147_v53 }
 0x260   : > { %v2811_v55 = vpop.f32.mrb[0].mxu1 }
 0x261   : > { %v3372_v56 = vadd.f32 %v2811_v55, %v2693_v54  ;;  %v741_v57 = vpop.f32.mrb[1].mxu1 }
 0x262   : > { %v3374_v58 = vadd.f32 %v2693_v54, %v741_v57 }
 0x263   : > { %843 = vrot.lane.b32.xlu1 %v3372_v56, %s3149_s16 }
 0x264   : > { %765 = vrot.lane.b32.xlu0 %v3374_v58, %s3149_s16  ;;  %s3159_s16 = smov 40  }
 0x2d5   : > { %v844_v60 = vpop.permute.xlu1 %843 }
 0x2d6   : > { %v766_v59 = vpop.permute.xlu0 %765 }
 0x2d7   : > { %2813 = vmatpush3.xpose.msk.msra.mxu1 %vm767_vm7, %v766_v59 }
 0x2d8   : > { %2817 = vmatprep.subr.mxu1 %v3147_v53 }
 0x2da   : > { %2815 = vmatmul.mubr.msk.f32.vlgmr.msra.gmra.mrb[2].mxu1 %vm767_vm7, %v3374_v58 }
 0x2db   : > { %2818 = vmatpush3.xpose.msk.msra.mxu1 %vm767_vm7, %v844_v60  ;;  %2819 = vmatprep.mubr.msk.f32.mxu1 %vm3148_vm6, %v3147_v53 }
 0x2dc   : > { %2827 = vmatprep.subr.mxu1 %v3147_v53 }
 0x2de   : > { %2820 = vmatmul.mubr.msk.f32.vlgmr.msra.gmra.mrb[4].mxu1 %vm767_vm7, %v3372_v56 }
 0x2df   : > { %2829 = vmatprep.mubr.msk.f32.mxu1 %vm3148_vm6, %v3147_v53 }
 0x3ad   : > { %v838_v62 = vpop.f32.mrb[2].mxu1 }
 0x3ae   : > { %v839_v63 = vadd.f32 %v3393_v61, %v838_v62  ;;  %v2816_v0 = vpop.f32.mrb[3].mxu1 }
 0x3b0   : > { %v919_v4 = vsel %vm767_vm7, %v839_v63, -inf }
 0x3b1   : > { %920 = vmax.xlane.f32.xlu1 %v919_v4  ;;  %v915_v5 = vpop.f32.mrb[4].mxu1 }
 0x3b2   : > { %v916_v6 = vadd.f32 %v3399_v1, %v915_v5  ;;  %v2821_v7 = vpop.f32.mrb[5].mxu1 }
 0x3b4   : > { %v922_v8 = vsel %vm767_vm7, %v916_v6, -inf }
 0x3b5   : > { %923 = vmax.xlane.f32.xlu0 %v922_v8 }
 0x3c2   : > { %1017 = vrot.lane.b32.xlu1 %v3372_v56, %s3150_s17 }
 0x3c6   : > { %1095 = vrot.lane.b32.xlu1 %v3374_v58, %s3151_s18 }
 0x3ca   : > { %1173 = vrot.lane.b32.xlu1 %v3372_v56, %s3151_s18 }
 0x3cb   : > { %941 = vrot.lane.b32.xlu0 %v3374_v58, %s3150_s17  ;;  %s3652_s17 = scalar_lea.vmem %s3623_s6, %s3283_s14 }
 0x43e   : > { %v921_v9 = vpop.xlane.xlu1 %920 }
 0x43f   : > { %v925_v10 = vsub.f32 %v839_v63, %v921_v9 }
 0x441   : > { %v927_v11 = vmul.f32 1.442695, %v925_v10 }
 0x442   : > { %v1018_v12 = vpop.permute.xlu1 %1017  ;;  %v924_v13 = vpop.xlane.xlu0 %923 }
 0x443   : > { %3026 = vpow2.f32 %v927_v11  ;;  %v926_v14 = vsub.f32 %v916_v6, %v924_v13  ;;  %2828 = vmatpush3.msra.mxu1 %v1018_v12 }
 0x444   : > { %2837 = vmatprep.subr.mxu1 %v3147_v53 }
 0x445   : > { %v929_v15 = vmul.f32 1.442695, %v926_v14 }
 0x446   : > { %v942_v16 = vpop.permute.xlu0 %941  ;;  %v1096_v21 = vpop.permute.xlu1 %1095 }
 0x447   : > { %3028 = vpow2.f32 %v929_v15  ;;  %2823 = vmatpush3.msra.mxu0 %v942_v16 }
 0x448   : > { %2832 = vmatprep.subr.mxu0 %v3147_v53 }
 0x44a   : > { %v1174_v22 = vpop.permute.xlu1 %1173 }
 0x44d   : > { %v3027_v17 = vpop.eup %3026 }
 0x44e   : > { %v931_v18 = vsel %vm767_vm7, %v3027_v17, 0.0 }
 0x44f   : > { %932 = vadd.xlane.f32.xlu0 %v931_v18 }
 0x451   : > { %v3029_v19 = vpop.eup %3028 }
 0x452   : > { %v934_v20 = vsel %vm767_vm7, %v3029_v19, 0.0 }
 0x453   : > { %935 = vadd.xlane.f32.xlu1 %v934_v20 }
 0x464   : > { %1171 = vrot.lane.b32.xlu1 %v3372_v56, %s3152_s20 }
 0x465   : > { %1093 = vrot.lane.b32.xlu0 %v3374_v58, %s3152_s20 }
 0x4dc   : > { %v933_v23 = vpop.xlane.xlu0 %932 }
 0x4dd   : > { %3030 = vrcp.f32 %v933_v23 }
 0x4e0   : > { %v936_v24 = vpop.xlane.xlu1 %935  ;;  %v1094_v29 = vpop.permute.xlu0 %1093 }
 0x4e1   : > { %3032 = vrcp.f32 %v936_v24 }
 0x4e4   : > { %v1172_v30 = vpop.permute.xlu1 %1171 }
 0x4e7   : > { %v3031_v25 = vpop.eup %3030 }
 0x4e8   : > { %v939_v26 = vmul.f32 %v3031_v25, %v3027_v17 }
 0x4ea   : > { %2825 = vmatmul.mubr.msk.f32.vlgmr.msra.gmra.mrb[0].mxu0 %vm767_vm7, %v939_v26 }
 0x4eb   : > { %v3033_v27 = vpop.eup %3032  ;;  %2833 = vmatpush3.xpose.msk.msra.mxu0 %vm767_vm7, %v1096_v21  ;;  %2834 = vmatprep.mubr.msk.f32.mxu0 %vm3148_vm6, %v3147_v53 }
 0x4ec   : > { %v940_v28 = vmul.f32 %v3033_v27, %v3029_v19  ;;  %2842 = vmatprep.subr.mxu0 %v3147_v53 }
 0x4ee   : > { %2830 = vmatmul.mubr.msk.f32.vlgmr.msra.gmra.mrb[6].mxu1 %vm767_vm7, %v940_v28  ;;  %2835 = vmatmul.mubr.msk.f32.vlgmr.msra.gmra.mrb[2].mxu0 %vm767_vm7, %v1094_v29 }
 0x4ef   : > { %2838 = vmatpush3.xpose.msk.msra.mxu1 %vm767_vm7, %v1174_v22  ;;  %2839 = vmatprep.mubr.msk.f32.mxu1 %vm3148_vm6, %v3147_v53 }
 0x4f0   : > { %2847 = vmatprep.subr.mxu1 %v3147_v53  ;;  %2844 = vmatprep.mubr.msk.f32.mxu0 %vm3148_vm6, %v3147_v53 }
 0x4f2   : > { %2840 = vmatmul.mubr.msk.f32.vlgmr.msra.gmra.mrb[8].mxu1 %vm767_vm7, %v1172_v30 }
 0x4f3   : > { %2849 = vmatprep.mubr.msk.f32.mxu1 %vm3148_vm6, %v3147_v53 }
 0x5bd   : > { %v3430_v31 = vpop.f32.mrb[0].mxu0 }
 0x5be   : > { %v2826_v32 = vpop.f32.mrb[1].mxu0 }
 0x5c1   : > { %v3432_v33 = vpop.f32.mrb[6].mxu1  ;;  %v1167_v34 = vpop.f32.mrb[2].mxu0 }
 0x5c2   : > { %v1168_v35 = vadd.f32 %v3393_v61, %v1167_v34  ;;  %v2831_v36 = vpop.f32.mrb[7].mxu1  ;;  %v2836_v37 = vpop.f32.mrb[3].mxu0 }
 0x5c4   : > { %v1249_v39 = vsel %vm767_vm7, %v1168_v35, -inf }
 0x5c5   : > { %1250 = vmax.xlane.f32.xlu0 %v1249_v39  ;;  %v1245_v40 = vpop.f32.mrb[8].mxu1 }
 0x5c6   : > { %v1246_v41 = vadd.f32 %v3399_v1, %v1245_v40  ;;  %v2841_v42 = vpop.f32.mrb[9].mxu1 }
 0x5c8   : > { %v1252_v44 = vsel %vm767_vm7, %v1246_v41, -inf }
 0x5c9   : > { %1253 = vmax.xlane.f32.xlu1 %v1252_v44 }
 0x5da   : > { %1347 = vrot.lane.b32.xlu1 %v3372_v56, %s3153_s21 }
 0x5db   : > { %1271 = vrot.lane.b32.xlu0 %v3374_v58, %s3153_s21 }
 0x5de   : > { %1425 = vrot.lane.b32.xlu1 %v3374_v58, %s3154_s24 }
 0x5e2   : > { %1503 = vrot.lane.b32.xlu1 %v3372_v56, %s3154_s24 }
 0x5e6   : > { %1501 = vrot.lane.b32.xlu1 %v3372_v56, %s3155_s25 }
 0x652   : > { %v1251_v45 = vpop.xlane.xlu0 %1250 }
 0x653   : > { %v1255_v46 = vsub.f32 %v1168_v35, %v1251_v45 }
 0x655   : > { %v1257_v47 = vmul.f32 1.442695, %v1255_v46 }
 0x656   : > { %v1272_v48 = vpop.permute.xlu0 %1271  ;;  %v1254_v49 = vpop.xlane.xlu1 %1253 }
 0x657   : > { %3034 = vpow2.f32 %v1257_v47  ;;  %v1256_v50 = vsub.f32 %v1246_v41, %v1254_v49  ;;  %2843 = vmatpush3.msra.mxu0 %v1272_v48 }
 0x658   : > { %2852 = vmatprep.subr.mxu0 %v3147_v53 }
 0x659   : > { %v1259_v51 = vmul.f32 1.442695, %v1256_v50 }
 0x65a   : > { %v1348_v52 = vpop.permute.xlu1 %1347 }
 0x65b   : > { %3036 = vpow2.f32 %v1259_v51  ;;  %2848 = vmatpush3.msra.mxu1 %v1348_v52 }
 0x65c   : > { %2857 = vmatprep.subr.mxu1 %v3147_v53 }
 0x65e   : > { %v1426_v63 = vpop.permute.xlu1 %1425 }
 0x661   : > { %v3035_v54 = vpop.eup %3034 }
 0x662   : > { %v1261_v55 = vsel %vm767_vm7, %v3035_v54, 0.0  ;;  %v1504_v6 = vpop.permute.xlu1 %1503 }
 0x663   : > { %1262 = vadd.xlane.f32.xlu0 %v1261_v55 }
 0x665   : > { %v3037_v57 = vpop.eup %3036 }
 0x666   : > { %v1264_v59 = vsel %vm767_vm7, %v3037_v57, 0.0  ;;  %v1502_v9 = vpop.permute.xlu1 %1501 }
 0x667   : > { %1265 = vadd.xlane.f32.xlu0 %v1264_v59 }
 0x67d   : > { %1423 = vrot.lane.b32.xlu0 %v3374_v58, %s3155_s25 }
 0x6f0   : > { %v1263_v60 = vpop.xlane.xlu0 %1262 }
 0x6f1   : > { %3038 = vrcp.f32 %v1263_v60 }
 0x6f4   : > { %v1266_v62 = vpop.xlane.xlu0 %1265 }
 0x6f5   : > { %3040 = vrcp.f32 %v1266_v62 }
 0x6f8   : > { %v1424_v8 = vpop.permute.xlu0 %1423 }
 0x6fb   : > { %v3039_v0 = vpop.eup %3038 }
 0x6fc   : > { %v1269_v4 = vmul.f32 %v3039_v0, %v3035_v54 }
 0x6fe   : > { %2845 = vmatmul.mubr.msk.f32.vlgmr.msra.gmra.mrb[4].mxu0 %vm767_vm7, %v1269_v4 }
 0x6ff   : > { %v3041_v5 = vpop.eup %3040  ;;  %2853 = vmatpush3.xpose.msk.msra.mxu0 %vm767_vm7, %v1426_v63  ;;  %2854 = vmatprep.mubr.msk.f32.mxu0 %vm3148_vm6, %v3147_v53 }
 0x700   : > { %v1270_v7 = vmul.f32 %v3041_v5, %v3037_v57  ;;  %2862 = vmatprep.subr.mxu0 %v3147_v53 }
 0x702   : > { %2850 = vmatmul.mubr.msk.f32.vlgmr.msra.gmra.mrb[10].mxu1 %vm767_vm7, %v1270_v7  ;;  %2855 = vmatmul.mubr.msk.f32.vlgmr.msra.gmra.mrb[6].mxu0 %vm767_vm7, %v1424_v8 }
 0x703   : > { %2858 = vmatpush3.xpose.msk.msra.mxu1 %vm767_vm7, %v1504_v6  ;;  %2859 = vmatprep.mubr.msk.f32.mxu1 %vm3148_vm6, %v3147_v53 }
 0x704   : > { %2867 = vmatprep.subr.mxu1 %v3147_v53  ;;  %2864 = vmatprep.mubr.msk.f32.mxu0 %vm3148_vm6, %v3147_v53 }
 0x706   : > { %2860 = vmatmul.mubr.msk.f32.vlgmr.msra.gmra.mrb[12].mxu1 %vm767_vm7, %v1502_v9 }
 0x707   : > { %2869 = vmatprep.mubr.msk.f32.mxu1 %vm3148_vm6, %v3147_v53 }
 0x7d1   : > { %v3464_v10 = vpop.f32.mrb[4].mxu0 }
 0x7d2   : > { %v2846_v11 = vpop.f32.mrb[5].mxu0 }
 0x7d5   : > { %v3466_v12 = vpop.f32.mrb[10].mxu1  ;;  %v1497_v13 = vpop.f32.mrb[6].mxu0 }
 0x7d6   : > { %v1498_v14 = vadd.f32 %v3393_v61, %v1497_v13  ;;  %v2851_v15 = vpop.f32.mrb[11].mxu1  ;;  %v2856_v16 = vpop.f32.mrb[7].mxu0 }
 0x7d8   : > { %v1579_v17 = vsel %vm767_vm7, %v1498_v14, -inf }
 0x7d9   : > { %1580 = vmax.xlane.f32.xlu0 %v1579_v17  ;;  %v1575_v18 = vpop.f32.mrb[12].mxu1  ;;  %v2115_v17 = vld [vmem:[%s3304_s27] sm:$0xff] }
 0x7da   : > { %v1576_v19 = vadd.f32 %v3399_v1, %v1575_v18  ;;  %v2861_v20 = vpop.f32.mrb[13].mxu1  ;;  %v2116_v18 = vld [vmem:[%s3304_s27 + $0x8] sm:$0xff] }
 0x7db   : > { %v2118_v20 = vld [vmem:[%s3304_s27 + $0x18] sm:$0xff] }
 0x7dc   : > { %v1582_v21 = vsel %vm767_vm7, %v1576_v19, -inf }
 0x7dd   : > { %1583 = vmax.xlane.f32.xlu1 %v1582_v21 }
 0x7ee   : > { %1677 = vrot.lane.b32.xlu1 %v3372_v56, %s3156_s5 }
 0x7ef   : > { %1601 = vrot.lane.b32.xlu0 %v3374_v58, %s3156_s5 }
 0x7f2   : > { %1755 = vrot.lane.b32.xlu1 %v3374_v58, %s3157_s28 }
 0x7f6   : > { %1833 = vrot.lane.b32.xlu1 %v3372_v56, %s3157_s28 }
 0x7fa   : > { %1831 = vrot.lane.b32.xlu1 %v3372_v56, %s3158_s29 }
 0x866   : > { %v1581_v22 = vpop.xlane.xlu0 %1580 }
 0x867   : > { %v1585_v23 = vsub.f32 %v1498_v14, %v1581_v22 }
 0x869   : > { %v1587_v24 = vmul.f32 1.442695, %v1585_v23 }
 0x86a   : > { %v1602_v25 = vpop.permute.xlu0 %1601  ;;  %v1584_v26 = vpop.xlane.xlu1 %1583 }
 0x86b   : > { %3042 = vpow2.f32 %v1587_v24  ;;  %v1586_v27 = vsub.f32 %v1576_v19, %v1584_v26  ;;  %2863 = vmatpush3.msra.mxu0 %v1602_v25  ;;  %v2117_v19 = vld [vmem:[%s3304_s27 + $0x10] sm:$0xff] }
 0x86c   : > { %2872 = vmatprep.subr.mxu0 %v3147_v53  ;;  %v2945_v21 = vpack.c.bf16 %v2118_v20, %v2117_v19 }
 0x86d   : > { %v1589_v28 = vmul.f32 1.442695, %v1586_v27 }
 0x86e   : > { %v1678_v29 = vpop.permute.xlu1 %1677 }
 0x86f   : > { %3044 = vpow2.f32 %v1589_v28  ;;  %2868 = vmatpush3.msra.mxu1 %v1678_v29 }
 0x870   : > { %2877 = vmatprep.subr.mxu1 %v3147_v53 }
 0x872   : > { %v1756_v39 = vpop.permute.xlu1 %1755 }
 0x875   : > { %v3043_v30 = vpop.eup %3042 }
 0x876   : > { %v1591_v32 = vsel %vm767_vm7, %v3043_v30, 0.0  ;;  %v1834_v44 = vpop.permute.xlu1 %1833 }
 0x877   : > { %1592 = vadd.xlane.f32.xlu0 %v1591_v32 }
 0x879   : > { %v3045_v34 = vpop.eup %3044 }
 0x87a   : > { %v1594_v35 = vsel %vm767_vm7, %v3045_v34, 0.0  ;;  %v1832_v47 = vpop.permute.xlu1 %1831 }
 0x87b   : > { %1595 = vadd.xlane.f32.xlu0 %v1594_v35 }
 0x891   : > { %1753 = vrot.lane.b32.xlu0 %v3374_v58, %s3158_s29 }
 0x904   : > { %v1593_v36 = vpop.xlane.xlu0 %1592 }
 0x905   : > { %3046 = vrcp.f32 %v1593_v36 }
 0x908   : > { %v1596_v37 = vpop.xlane.xlu0 %1595 }
 0x909   : > { %3048 = vrcp.f32 %v1596_v37 }
 0x90c   : > { %v1754_v46 = vpop.permute.xlu0 %1753 }
 0x90f   : > { %v3047_v40 = vpop.eup %3046 }
 0x910   : > { %v1599_v41 = vmul.f32 %v3047_v40, %v3043_v30 }
 0x912   : > { %2865 = vmatmul.mubr.msk.f32.vlgmr.msra.gmra.mrb[8].mxu0 %vm767_vm7, %v1599_v41 }
 0x913   : > { %v3049_v42 = vpop.eup %3048  ;;  %2873 = vmatpush3.xpose.msk.msra.mxu0 %vm767_vm7, %v1756_v39  ;;  %2874 = vmatprep.mubr.msk.f32.mxu0 %vm3148_vm6, %v3147_v53 }
 0x914   : > { %v1600_v45 = vmul.f32 %v3049_v42, %v3045_v34  ;;  %2882 = vmatprep.subr.mxu0 %v3147_v53 }
 0x916   : > { %2870 = vmatmul.mubr.msk.f32.vlgmr.msra.gmra.mrb[14].mxu1 %vm767_vm7, %v1600_v45  ;;  %2875 = vmatmul.mubr.msk.f32.vlgmr.msra.gmra.mrb[10].mxu0 %vm767_vm7, %v1754_v46 }
 0x917   : > { %2878 = vmatpush3.xpose.msk.msra.mxu1 %vm767_vm7, %v1834_v44  ;;  %2879 = vmatprep.mubr.msk.f32.mxu1 %vm3148_vm6, %v3147_v53 }
 0x918   : > { %2887 = vmatprep.subr.mxu1 %v3147_v53  ;;  %2884 = vmatprep.mubr.msk.f32.mxu0 %vm3148_vm6, %v3147_v53 }
 0x91a   : > { %2880 = vmatmul.mubr.msk.f32.vlgmr.msra.gmra.mrb[16].mxu1 %vm767_vm7, %v1832_v47 }
 0x91b   : > { %2889 = vmatprep.mubr.msk.f32.mxu1 %vm3148_vm6, %v3147_v53 }
 0x9e5   : > { %v1673_v48 = vpop.f32.mrb[8].mxu0 }
 0x9e6   : > { %v2866_v49 = vpop.f32.mrb[9].mxu0 }
 0x9e9   : > { %v1749_v50 = vpop.f32.mrb[14].mxu1  ;;  %v1827_v51 = vpop.f32.mrb[10].mxu0 }
 0x9ea   : > { %v1828_v52 = vadd.f32 %v3393_v61, %v1827_v51  ;;  %v2871_v54 = vpop.f32.mrb[15].mxu1  ;;  %v2876_v55 = vpop.f32.mrb[11].mxu0 }
 0x9ec   : > { %v1909_v57 = vsel %vm767_vm7, %v1828_v52, -inf }
 0x9ed   : > { %1910 = vmax.xlane.f32.xlu0 %v1909_v57  ;;  %v1905_v59 = vpop.f32.mrb[16].mxu1 }
 0x9ee   : > { %v1906_v60 = vadd.f32 %v3399_v1, %v1905_v59  ;;  %v2881_v62 = vpop.f32.mrb[17].mxu1 }
 0x9ef   : > { %v2263_v62 = vld [vmem:[%s3318_s3 + $0x8] sm:$0xff] }
 0x9f0   : > { %v1912_v63 = vsel %vm767_vm7, %v1906_v60, -inf }
 0x9f1   : > { %1913 = vmax.xlane.f32.xlu1 %v1912_v63  ;;  %v2264_v63 = vld [vmem:[%s3318_s3 + $0x10] sm:$0xff] }
 0xa02   : > { %2007 = vrot.lane.b32.xlu1 %v3372_v56, %s3159_s16 }
 0xa06   : > { %2085 = vrot.lane.b32.xlu1 %v3464_v10, %s3160_s19 }
 0xa0a   : > { %2087 = vrot.lane.b32.xlu1 %v3466_v12, %s3160_s19 }
 0xa0e   : > { %2095 = vrot.lane.b32.xlu1 %v1749_v50, %s3161_s22 }
 0xa7a   : > { %v1911_v53 = vpop.xlane.xlu0 %1910 }
 0xa7b   : > { %v1915_v61 = vsub.f32 %v1828_v52, %v1911_v53 }
 0xa7d   : > { %v1917_v0 = vmul.f32 1.442695, %v1915_v61  ;;  %v2265_v61 = vld [vmem:[%s3318_s3 + $0x18] sm:$0xff] }
 0xa7e   : > { %v1914_v1 = vpop.xlane.xlu1 %1913 }
 0xa7f   : > { %3050 = vpow2.f32 %v1917_v0  ;;  %v1916_v4 = vsub.f32 %v1906_v60, %v1914_v1  ;;  %v2262_v60 = vld [vmem:[%s3318_s3] sm:$0xff]  ;;  %v2953_v0 = vpack.c.bf16 %v2265_v61, %v2264_v63 }
 0xa80   : > { %v2949_v53 = vpack.c.bf16 %v2263_v62, %v2262_v60  ;;  %v2356_v1 = vld [vmem:[%s3332_s2] sm:$0xff] }
 0xa81   : > { %v1919_v5 = vmul.f32 1.442695, %v1916_v4  ;;  %v2357_v4 = vld [vmem:[%s3332_s2 + $0x8] sm:$0xff] }
 0xa82   : > { %v2008_v6 = vpop.permute.xlu1 %2007 }
 0xa83   : > { %3052 = vpow2.f32 %v1919_v5  ;;  %2888 = vmatpush3.msra.mxu1 %v2008_v6  ;;  %v2358_v5 = vld [vmem:[%s3332_s2 + $0x10] sm:$0xff]  ;;  %v2957_v6 = vpack.c.bf16 %v2357_v4, %v2356_v1 }
 0xa84   : > { %2950 = vmatprep.subr.bf16.mxu1 %v2949_v53 }
 0xa86   : > { %v2086_v26 = vpop.permute.xlu1 %2085 }
 0xa87   : > { %v2107_v29 = vsel %vm767_vm7, %v3430_v31, %v2086_v26  ;;  %v2722_v31 = vld [vmem:[%s3652_s17] ss:$0 sm:$0xff] }
 0xa89   : > { %v3051_v56 = vpop.eup %3050 }
 0xa8a   : > { %v1921_v7 = vsel %vm767_vm7, %v3051_v56, 0.0  ;;  %v2088_v27 = vpop.permute.xlu1 %2087 }
 0xa8b   : > { %1922 = vadd.xlane.f32.xlu0 %v1921_v7  ;;  %v2108_v36 = vsel %vm767_vm7, %v3432_v33, %v2088_v27 }
 0xa8d   : > { %v3053_v8 = vpop.eup %3052 }
 0xa8e   : > { %v1924_v9 = vsel %vm767_vm7, %v3053_v8, 0.0  ;;  %v2096_v30 = vpop.permute.xlu1 %2095 }
 0xa8f   : > { %1925 = vadd.xlane.f32.xlu0 %v1924_v9  ;;  %v2111_v37 = vsel %vm2109_vm9, %v2108_v36, %v2096_v30  ;;  %v2361_v9 = vld [vmem:[%s3332_s2 + $0x28] sm:$0xff] }
 0xaa5   : > { %1931 = vrot.lane.b32.xlu0 %v3374_v58, %s3159_s16  ;;  %v2941_v58 = vpack.c.bf16 %v2116_v18, %v2115_v17 }
 0xaa9   : > { %2093 = vrot.lane.b32.xlu0 %v1673_v48, %s3161_s22 }
 0xb18   : > { %v1923_v10 = vpop.xlane.xlu0 %1922 }
 0xb19   : > { %3054 = vrcp.f32 %v1923_v10 }
 0xb1c   : > { %v1926_v11 = vpop.xlane.xlu0 %1925 }
 0xb1d   : > { %3056 = vrcp.f32 %v1926_v11 }
 0xb20   : > { %v1932_v12 = vpop.permute.xlu0 %1931 }
 0xb21   : > { %2883 = vmatpush3.msra.mxu0 %v1932_v12 }
 0xb22   : > { %2942 = vmatprep.subr.bf16.mxu0 %v2941_v58 }
 0xb23   : > { %v3055_v13 = vpop.eup %3054 }
 0xb24   : > { %v1929_v14 = vmul.f32 %v3055_v13, %v3051_v56  ;;  %v2094_v28 = vpop.permute.xlu0 %2093  ;;  %v2359_v56 = vld [vmem:[%s3332_s2 + $0x18] sm:$0xff] }
 0xb25   : > { %v2110_v32 = vsel %vm2109_vm9, %v2107_v29, %v2094_v28  ;;  %v2961_v7 = vpack.c.bf16 %v2359_v56, %v2358_v5 }
 0xb26   : > { %2885 = vmatmul.mubr.msk.f32.vlgmr.msra.gmra.mrb[12].mxu0 %vm767_vm7, %v1929_v14 }
 0xb27   : > { %v3057_v15 = vpop.eup %3056  ;;  %2944 = vmatpush3.bf16.msra.mxu0 %v2941_v58 }
 0xb28   : > { %v1930_v16 = vmul.f32 %v3057_v15, %v3053_v8  ;;  %2946 = vmatprep.subr.bf16.mxu0 %v2945_v21  ;;  %v2360_v8 = vld [vmem:[%s3332_s2 + $0x20] sm:$0xff] }
 0xb29   : > { %v2965_v10 = vpack.c.bf16 %v2361_v9, %v2360_v8 }
 0xb2a   : > { %2890 = vmatmul.mubr.msk.f32.vlgmr.msra.gmra.mrb[18].mxu1 %vm767_vm7, %v1930_v16 }
 0xb2b   : > { %2948 = vmatpush3.bf16.msra.mxu0 %v2945_v21  ;;  %2952 = vmatpush3.bf16.msra.mxu1 %v2949_v53 }
 0xb2c   : > { %2954 = vmatprep.subr.bf16.mxu1 %v2953_v0  ;;  %2958 = vmatprep.subr.bf16.mxu0 %v2957_v6 }
 0xb2f   : > { %2956 = vmatpush3.bf16.msra.mxu1 %v2953_v0 }
 0xbf9   : > { %v2003_v22 = vpop.f32.mrb[12].mxu0 }
 0xbfa   : > { %2101 = vrot.lane.b32.xlu0 %v2003_v22, %s3162_s30  ;;  %v2886_v23 = vpop.f32.mrb[13].mxu0 }
 0xbfd   : > { %v2079_v24 = vpop.f32.mrb[18].mxu1 }
 0xbfe   : > { %2103 = vrot.lane.b32.xlu1 %v2079_v24, %s3162_s30  ;;  %v2891_v25 = vpop.f32.mrb[19].mxu1 }
 0xbff   : > { %v2209_v25 = vld [vmem:[%s3313_s13] sm:$0x3] }
 0xc00   : > { %v2247_v27 = vrot.slane %v2209_v25, %v3352_v38  ;;  %v2259_v28 = vrot.slane %v2209_v25, %v3356_v43 }
 0xc6c   : > { %v2102_v34 = vpop.permute.xlu0 %2101 }
 0xc6d   : > { %v2113_v35 = vsel %vm2112_vm8, %v2110_v32, %v2102_v34 }
 0xc6e   : > { %2900 = vmatprep.mubr.msk.f32.mxu0 %vm604_vm1, %v2113_v35 }
 0xc70   : > { %v2104_v39 = vpop.permute.xlu1 %2103 }
 0xc71   : > { %v2114_v40 = vsel %vm2112_vm8, %v2111_v37, %v2104_v39 }
 0xc72   : > { %2901 = vmatmul.mubr.msk.f32.vlgmr.msra.gmra.mrb[14].mxu0 %vm604_vm1, %v2114_v40  ;;  %v2362_v40 = vld [vmem:[%s3332_s2 + $0x30] sm:$0xff] }
 0xc73   : > { %2960 = vmatpush3.bf16.msra.mxu0 %v2957_v6 }
 0xc74   : > { %2962 = vmatprep.subr.bf16.mxu0 %v2961_v7 }
 0xc77   : > { %2964 = vmatpush3.bf16.msra.mxu0 %v2961_v7 }
 0xc78   : > { %2966 = vmatprep.subr.bf16.mxu0 %v2965_v10 }
 0xc7b   : > { %2968 = vmatpush3.bf16.msra.mxu0 %v2965_v10 }
 0xd45   : > { %v2902_v41 = vpop.f32.mrb[14].mxu0 }
 0xd46   : > { %v2204_v42 = vadd.f32 %v2902_v41, %v2722_v31  ;;  %v2198_v44 = vpop.f32.mrb[15].mxu0 }
 0xd47   : > { %v2199_v45 = vadd.f32 %v2722_v31, %v2198_v44  ;;  %v2363_v31 = vld [vmem:[%s3332_s2 + $0x38] sm:$0xff] }
 0xd48   : > { %v3528_v46 = vadd.f32 %v2204_v42, %v3338_v3  ;;  %v2969_v41 = vpack.c.bf16 %v2363_v31, %v2362_v40  ;;  %v2725_v42 = vld [vmem:[%s583_s23] ss:$0 sm:$0xff] }
 0xd49   : > { %v3531_v47 = vadd.f32 %v2199_v45, %v3336_v2 }
 0xd4a   : > { %v2213_v33 = vsel %vm604_vm1, %v3528_v46, 0.0  ;;  %2970 = vmatprep.subr.bf16.mxu0 %v2969_v41 }
 0xd4b   : > { %2214 = vadd.xlane.f32.xlu1 %v2213_v33  ;;  %v2210_v48 = vsel %vm604_vm1, %v3531_v47, 0.0  ;;  %2972 = vmatpush3.bf16.msra.mxu0 %v2969_v41 }
 0xd4c   : > { %2211 = vadd.xlane.f32.xlu0 %v2210_v48 }
 0xdd8   : > { %v2215_v49 = vpop.xlane.xlu1 %2214 }
 0xdd9   : > { %v2217_v50 = vmul.f32 0.03125, %v2215_v49  ;;  %v2212_v51 = vpop.xlane.xlu0 %2211 }
 0xdda   : > { %v2216_v3 = vmul.f32 0.03125, %v2212_v51  ;;  %v2728_v51 = vld [vmem:[%s591_s0] ss:$0 sm:$0xff] }
 0xddb   : > { %v3538_v52 = vsub.f32 %v3528_v46, %v2217_v50 }
 0xddc   : > { %v2218_v2 = vsub.f32 %v3531_v47, %v2216_v3 }
 0xddd   : > { %v2221_v57 = vmul.f32 %v3538_v52, %v3538_v52  ;;  %v2249_v34 = vmul.f32 %v2247_v27, %v3538_v52 }
 0xdde   : > { %v2220_v54 = vmul.f32 %v2218_v2, %v2218_v2  ;;  %v2248_v29 = vmul.f32 %v2247_v27, %v2218_v2 }
 0xddf   : > { %v2225_v59 = vsel %vm604_vm1, %v2221_v57, 0.0 }
 0xde0   : > { %v2222_v55 = vsel %vm604_vm1, %v2220_v54, 0.0 }
 0xde1   : > { %2223 = vadd.xlane.f32.xlu0 %v2222_v55 }
 0xde5   : > { %2226 = vadd.xlane.f32.xlu0 %v2225_v59 }
 0xe6e   : > { %v2224_v11 = vpop.xlane.xlu0 %2223 }
 0xe6f   : > { %v2228_v12 = vmul.f32 0.032258064, %v2224_v11 }
 0xe71   : > { %3058 = vrsqrt.f32 %v2228_v12  ;;  %vm2232_vm10 = vcmp.eq.f32.partialorder %v2228_v12, inf  ;;  %v2235_v17 = vand.u32 2147483648, %v2228_v12  ;;  %vm2234_vm11 = vcmp.eq.f32.partialorder %v2228_v12, 0.0 }
 0xe72   : > { %v2227_v13 = vpop.xlane.xlu0 %2226 }
 0xe73   : > { %v2229_v14 = vmul.f32 0.032258064, %v2227_v13 }
 0xe75   : > { %3060 = vrsqrt.f32 %v2229_v14  ;;  %vm2239_vm12 = vcmp.eq.f32.partialorder %v2229_v14, inf  ;;  %v2242_v22 = vand.u32 2147483648, %v2229_v14  ;;  %vm2241_vm13 = vcmp.eq.f32.partialorder %v2229_v14, 0.0 }
 0xe7b   : > { %v3059_v15 = vpop.eup %3058 }
 0xe7c   : > { %v2231_v16 = vmul.f32 %v3059_v15, %v2228_v12 }
 0xe7e   : > { %v2233_v18 = vsel %vm2232_vm10, %v2228_v12, %v2231_v16 }
 0xe7f   : > { %v3061_v58 = vpop.eup %3060  ;;  %v2236_v19 = vsel %vm2234_vm11, %v2235_v17, %v2233_v18 }
 0xe80   : > { %v2238_v20 = vmul.f32 %v3061_v58, %v2229_v14  ;;  %v2250_v21 = vadd.f32 1e-06, %v2236_v19 }
 0xe82   : > { %v2240_v23 = vsel %vm2239_vm12, %v2229_v14, %v2238_v20  ;;  %3062 = vrcp.f32 %v2250_v21 }
 0xe83   : > { %v2243_v24 = vsel %vm2241_vm13, %v2242_v22, %v2240_v23 }
 0xe84   : > { %v2251_v26 = vadd.f32 1e-06, %v2243_v24 }
 0xe86   : > { %3064 = vrcp.f32 %v2251_v26 }
 0xe8c   : > { %v3063_v30 = vpop.eup %3062 }
 0xe8d   : > { %v2253_v32 = vmul.f32 %v3063_v30, %v2248_v29 }
 0xe8f   : > { %v2260_v35 = vadd.f32 %v2259_v28, %v2253_v32 }
 0xe90   : > { %v3065_v36 = vpop.eup %3064 }
 0xe91   : > { %2911 = vmatprep.mubr.msk.f32.mxu1 %vm604_vm1, %v2260_v35  ;;  %v2255_v37 = vmul.f32 %v3065_v36, %v2249_v34 }
 0xe93   : > { %v2261_v39 = vadd.f32 %v2259_v28, %v2255_v37 }
 0xe95   : > { %2912 = vmatmul.mubr.msk.f32.vlgmr.msra.gmra.mrb[20].mxu1 %vm604_vm1, %v2261_v39 }
 0xf68   : > { %v2913_v44 = vpop.f32.mrb[20].mxu1 }
 0xf69   : > { %v2351_v45 = vadd.f32 %v2913_v44, %v2725_v42  ;;  %v2345_v33 = vpop.f32.mrb[21].mxu1 }
 0xf6a   : > { %v2346_v48 = vadd.f32 %v2725_v42, %v2345_v33 }
 0xf6b   : > { %v2355_v50 = vmax.f32 %v2351_v45, 0.0 }
 0xf6c   : > { %v2354_v49 = vmax.f32 %v2346_v48, 0.0 }
 0xf6e   : > { %2930 = vmatprep.mubr.msk.f32.mxu0 %vm2371_vm14, %v2354_v49 }
 0xf6f   : > { %2931 = vmatmul.mubr.msk.f32.vlgmr.msra.gmra.mrb[16].mxu0 %vm2371_vm14, %v2355_v50 }
0x1040   : > { %2458 = sbr.rel (%p2731_p4) target bundleno = 4169 (0x1049), region = 84 }
0x1042   : > { %v2932_v3 = vpop.f32.mrb[16].mxu0 }
0x1043   : > { %v2450_v52 = vadd.f32 %v2932_v3, %v2728_v51  ;;  %v2444_v2 = vpop.f32.mrb[17].mxu0 }
0x1044   : > { %v2445_v54 = vadd.f32 %v2728_v51, %v2444_v2 }
0x1045   : > { %v2454_v55 = vadd.f32 %v2450_v52, %v3528_v46 }
0x1046   : > { %v2453_v57 = vadd.f32 %v2445_v54, %v3531_v47 }
0x1047   : > { %2460 = vst.msk [vmem:[#allocation5 + $0x8] sm:$0xff] %vm604_vm1, %v2454_v55 }
0x1048   : > { %2459 = vst.msk [vmem:[#allocation5] sm:$0xff] %vm604_vm1, %v2453_v57 }
0x1049 PF: > { %p2732_p6 = scmp.ne.s32.totalorder %s3241_s26, 1 }
0x104a   : > { %v2466_v59 = vsel (!%p2732_p6), %vm604_vm1, %v2453_v57, 0.0  ;;  %v2469_v60 = vsel (!%p2732_p6), %vm604_vm1, %v2454_v55, 0.0  ;;  %v2465_v19 = vld [vmem:[%s3629_s12] sm:$0x3] (!%p2732_p6) }
0x104b   : > { %2464 = sbr.rel (%p2732_p6) target bundleno = 4501 (0x1195), region = 88  ;;  %2467 = vadd.xlane.f32.xlu0 (!%p2732_p6), %v2466_v59  ;;  %v2503_v21 = vrot.slane (!%p2732_p6), %v2465_v19, %v3352_v38  ;;  %v2515_v23 = vrot.slane (!%p2732_p6), %v2465_v19, %v3356_v43 }
0x104f   : > { %2470 = vadd.xlane.f32.xlu0 (!%p2732_p6), %v2469_v60 }
0x10d8   : > { %v2468_v46 = vpop.xlane.xlu0 %2467 }
0x10d9   : > { %v2472_v62 = vmul.f32 0.03125, %v2468_v46 }
0x10db   : > { %v2474_v47 = vsub.f32 %v2453_v57, %v2472_v62 }
0x10dc   : > { %v2471_v63 = vpop.xlane.xlu0 %2470 }
0x10dd   : > { %v2473_v53 = vmul.f32 0.03125, %v2471_v63  ;;  %v2476_v61 = vmul.f32 %v2474_v47, %v2474_v47  ;;  %v2504_v22 = vmul.f32 %v2503_v21, %v2474_v47 }
0x10df   : > { %v2475_v0 = vsub.f32 %v2454_v55, %v2473_v53  ;;  %v2478_v1 = vsel %vm604_vm1, %v2476_v61, 0.0 }
0x10e0   : > { %2479 = vadd.xlane.f32.xlu1 %v2478_v1 }
0x10e1   : > { %v2477_v4 = vmul.f32 %v2475_v0, %v2475_v0  ;;  %v2505_v26 = vmul.f32 %v2503_v21, %v2475_v0 }
0x10e3   : > { %v2481_v5 = vsel %vm604_vm1, %v2477_v4, 0.0 }
0x10e4   : > { %2482 = vadd.xlane.f32.xlu1 %v2481_v5 }
0x116d   : > { %v2480_v6 = vpop.xlane.xlu1 %2479 }
0x116e   : > { %v2484_v56 = vmul.f32 0.032258064, %v2480_v6 }
0x1170   : > { %3066 = vrsqrt.f32 %v2484_v56  ;;  %vm2488_vm15 = vcmp.eq.f32.partialorder %v2484_v56, inf  ;;  %v2491_v11 = vand.u32 2147483648, %v2484_v56  ;;  %vm2490_vm0 = vcmp.eq.f32.partialorder %v2484_v56, 0.0 }
0x1171   : > { %v2483_v7 = vpop.xlane.xlu1 %2482 }
0x1172   : > { %v2485_v8 = vmul.f32 0.032258064, %v2483_v7 }
0x1174   : > { %3068 = vrsqrt.f32 %v2485_v8  ;;  %vm2495_vm2 = vcmp.eq.f32.partialorder %v2485_v8, inf  ;;  %v2498_v17 = vand.u32 2147483648, %v2485_v8  ;;  %vm2497_vm3 = vcmp.eq.f32.partialorder %v2485_v8, 0.0 }
0x117a   : > { %v3067_v9 = vpop.eup %3066 }
0x117b   : > { %v2487_v10 = vmul.f32 %v3067_v9, %v2484_v56 }
0x117d   : > { %v2489_v12 = vsel %vm2488_vm15, %v2484_v56, %v2487_v10 }
0x117e   : > { %v3069_v13 = vpop.eup %3068  ;;  %v2492_v14 = vsel %vm2490_vm0, %v2491_v11, %v2489_v12 }
0x117f   : > { %v2506_v15 = vadd.f32 1e-06, %v2492_v14  ;;  %v2494_v16 = vmul.f32 %v3069_v13, %v2485_v8 }
0x1181   : > { %3070 = vrcp.f32 %v2506_v15  ;;  %v2496_v18 = vsel %vm2495_vm2, %v2485_v8, %v2494_v16 }
0x1182   : > { %v2499_v58 = vsel %vm2497_vm3, %v2498_v17, %v2496_v18 }
0x1183   : > { %v2507_v20 = vadd.f32 1e-06, %v2499_v58 }
0x1185   : > { %3072 = vrcp.f32 %v2507_v20 }
0x118b   : > { %v3071_v24 = vpop.eup %3070 }
0x118c   : > { %v2509_v25 = vmul.f32 %v3071_v24, %v2504_v22 }
0x118e   : > { %v2516_v27 = vadd.f32 %v2515_v23, %v2509_v25 }
0x118f   : > { %v3073_v28 = vpop.eup %3072 }
0x1190   : > { %2518 = vst.msk [vmem:[#allocation5] sm:$0xff] %vm604_vm1, %v2516_v27  ;;  %v2511_v29 = vmul.f32 %v3073_v28, %v2505_v26 }
0x1192   : > { %v2517_v30 = vadd.f32 %v2515_v23, %v2511_v29 }
0x1194   : > { %2519 = vst.msk [vmem:[#allocation5 + $0x8] sm:$0xff] %vm604_vm1, %v2517_v30 }
0x1195 PF: > { %p2987_p10 = scmp.eq.s32.totalorder %s3241_s26, 1  ;;  %s3163_s0 = smov [#allocation5]  }
0x1196   : > { %s2526_s2 = sshll.u32 %s3163_s0, 4  ;;  %s2527_s2 = int_to_ptr.vmem [resolvable:$true] %s2526_s2 }
0x1197   : > { %s3102_s21 = scalar_lea.vmem %s2527_s2, 256  ;;  %p3109_p0 = scmp.lt.s32.totalorder %s2527_s2, %s2527_s2 }
0x1198   : > { %p3103_p11 = scmp.ne.s32.totalorder %s2527_s2, %s3102_s21  ;;  %p3110_p1 = scmp.lt.s32.totalorder %s3102_s21, %s3102_s21 }
0x119a   : > { %p3104_p12 = pnand %p3103_p11, %p2987_p10  ;;  %p3111_p5 = por %p3110_p1, %p3109_p0 }
0x119c   : > { %p3105_p13 = pneg %p3104_p12 }
0x119e   : > { %p3112_p7 = pnand %p3111_p5, %p3105_p13 }
0x11a0   : > { %3115 = shalt.err (!%p3112_p7)
}
0x11a1   : > { %s3653_s5 = sld [smem:[#allocation13_spill]] }
0x11a7   : > { %s3116_s28 = scalar_lea.hbm %s3653_s5, 256 }
0x11a8   : > { %p3117_p9 = scmp.ne.s32.totalorder %s3653_s5, %s3116_s28  ;;  %p3122_p3 = scmp.lt.u32.totalorder %s3116_s28, %s3653_s5 }
0x11aa   : > { %p3118_p8 = pnand %p3117_p9, %p2987_p10 }
0x11ac   : > { %p3119_p2 = pneg %p3118_p8 }
0x11ae   : > { %p3124_p4 = pnand %p3122_p3, %p3119_p2 }
0x11b0   : > { %3127 = shalt.err (!%p3124_p4)
}
0x11b1   : > { %s3164_s27 = smov 128  }
0x11b2   : > { %2978 = dma.vmem_to_hbm [thread:$0]  (%p2987_p10), %s2527_s2, 256, %s3653_s5, [#allocation4], %s3164_s27, %s3164_s27, %s3160_s19  }
0x11b3   : > { %3137 = dma.done.wait (%p2987_p10), [#allocation4], 256  }
0x11b4   : > { %3139 = vsyncadd (%p2987_p10), [#allocation4], 4294967040 }
0x11b5 PF: > { %s3654_s3 = sld [smem:[#allocation8_spill]] }
0x11bb   : > { %s25_s25 = sadd.s32 1, %s3654_s3  }
0x11bc   : > { %p22_p6 = scmp.ge.s32.totalorder %s25_s25, 4  }
0x11be   :  { %24 = sbr.rel (!%p22_p6) target bundleno = 8 (0x8), region = 143 }
0x11c5   :  { %2542 = vsyncpa [#allocation3], 1 }
0x11c6   :  { %2544 = vsyncpa [#allocation3 + $0x1], 1 }
0x11c7   :  { %2545 = vsyncpa [#allocation4], 1 }
0x11c8   :  { %2547 = vsyncpa [#allocation4 + $0x1], 1 }

</bundles_post_ra>
